<compile_context>
chip_gen: v6e
topology: v6e:2x2x1
jax: 0.10.0
libtpu: 0.0.40
codegen_flags: <defaults>
</compile_context>

<pallas_src>
import functools

import jax
import jax.numpy as jnp
from jax import lax
from jax.experimental import pallas as pl
from jax.experimental.pallas import tpu as pltpu

_SUB = 8  # TPU sublane count; batch is padded to a multiple of this.


# ----------------------------------------------------------------------------
# Fused kernel: every LSTM layer + final Linear for one 8-row batch block.
#
# refs layout (inputs, outputs, scratch); kernel views after squeezing:
#   x_ref      : (T*8, D_in)  time-major within the block (row = t*8 + lb)
#   per layer l: wih_l (D_l, 4H), whh_l (H, 4H), b_l (1, 4H)   [D_0=D_in, else H]
#   lin_w_ref  : (1, H)       final Linear weight row
#   lin_b_ref  : (1,)         final Linear bias (SMEM scalar)
#   out_ref    : (T*8, 1)     projected sequence for this block
#   gx_scr     : (T*8, 4H)    hoisted x-path gates for the current layer (VMEM)
#   act_scr    : (T*8, H)     current layer's output sequence (VMEM)
# ----------------------------------------------------------------------------
def _make_seq2seq_kernel(num_layers, T, H):

    def kernel(*refs):
        x_ref = refs[0]
        layer_refs = refs[1:1 + 3 * num_layers]
        lin_w_ref = refs[1 + 3 * num_layers]
        lin_b_ref = refs[2 + 3 * num_layers]
        out_ref = refs[3 + 3 * num_layers]
        gx_scr = refs[4 + 3 * num_layers]
        act_scr = refs[5 + 3 * num_layers]

        def run_recurrence(whh_ref):
            # Only h @ W_hh^T + gate nonlinearities stay on the per-step
            # critical path (the x-path is already parked in gx_scr).
            whh = whh_ref[...]  # (H, 4H), hoisted out of the time loop

            def step(t, carry):
                h, c = carry
                off = pl.multiple_of(t * _SUB, _SUB)  # sublane-aligned offset
                gates = gx_scr[pl.ds(off, _SUB), :] + jnp.dot(
                    h, whh, preferred_element_type=jnp.float32)
                # PyTorch gate order: i, f, g, o.
                if 4 * H <= 128:
                    # One vreg: 2 full-vreg EUP pushes + static lane slices.
                    sg = jax.nn.sigmoid(gates)
                    tg = jnp.tanh(gates)
                    i_g = sg[:, 0 * H:1 * H]
                    f_g = sg[:, 1 * H:2 * H]
                    g_g = tg[:, 2 * H:3 * H]
                    o_g = sg[:, 3 * H:4 * H]
                else:
                    i_g = jax.nn.sigmoid(gates[:, 0 * H:1 * H])
                    f_g = jax.nn.sigmoid(gates[:, 1 * H:2 * H])
                    g_g = jnp.tanh(gates[:, 2 * H:3 * H])
                    o_g = jax.nn.sigmoid(gates[:, 3 * H:4 * H])
                c_new = f_g * c + i_g * g_g
                h_new = o_g * jnp.tanh(c_new)
                act_scr[pl.ds(off, _SUB), :] = h_new  # full-sublane store
                return h_new, c_new

            zeros = jnp.zeros((_SUB, H), jnp.float32)
            # Bounded unroll: LLO visibility without blowing vreg live ranges.
            lax.fori_loop(0, T, step, (zeros, zeros), unroll=min(T, 8))

        # Layer loop (num_layers is static -> Python-unrolled, exact shapes).
        in_ref = x_ref
        for l in range(num_layers):
            wih_ref, whh_ref, b_ref = layer_refs[3 * l:3 * l + 3]
            # Hoisted x-path: one (T*8, D_l) x (D_l, 4H) matmul for the whole
            # sequence, bias folded in once.  For l >= 1 this reads act_scr in
            # full BEFORE the recurrence below overwrites it.
            gx_scr[...] = (
                jnp.dot(in_ref[...], wih_ref[...],
                        preferred_element_type=jnp.float32)
                + b_ref[...])
            run_recurrence(whh_ref)
            in_ref = act_scr

        # Fused final Linear(H, 1): broadcast-mul + lane reduction, single
        # small store to HBM.
        # TODO(synk): lane-dense (1, T*8) output layout (win is tiny at this size).
        act = act_scr[...]                                          # (T*8, H)
        y = jnp.sum(act * lin_w_ref[...], axis=-1, keepdims=True)   # (T*8, 1)
        out_ref[...] = y + lin_b_ref[0]

    return kernel


# ----------------------------------------------------------------------------
# Module forward: one fused pallas_call with a "parallel" grid over 8-row
# batch blocks.  Only trivially small pad / reshape / transpose glue stays
# outside the kernel.
# ----------------------------------------------------------------------------
@functools.partial(jax.jit, static_argnames=("num_layers",))
def seq2seq_b_forward(x_bf, params, num_layers):
    """x_bf: (B, T, input_size) batch_first, matching the PyTorch module."""
    B, T, D_in = x_bf.shape
    H = params["lstm"][0][1].shape[0]  # whh_t is (H, 4H)

    # Pad batch to a multiple of 8 sublanes; padded rows are ignored at the end.
    B_pad = ((B + _SUB - 1) // _SUB) * _SUB
    n_blk = B_pad // _SUB
    x_p = jnp.pad(x_bf, ((0, B_pad - B), (0, 0), (0, 0)))

    # Rearrange to (n_blk, T*8, D_in) with row = t*8 + lb inside each block.
    x_blk = (x_p.transpose(1, 0, 2)                 # (T, B_pad, D)
             .reshape(T, n_blk, _SUB, D_in)
             .transpose(1, 0, 2, 3)                 # (n_blk, T, 8, D)
             .reshape(n_blk, T * _SUB, D_in))

    flat_inputs = [x_blk]
    for (w_ih_t, w_hh_t, b) in params["lstm"]:
        flat_inputs += [w_ih_t, w_hh_t, b.reshape(1, 4 * H)]
    flat_inputs += [params["lin_w"], params["lin_b"]]

    def whole(shape):
        # Whole-array VMEM block, same block for every grid step.
        return pl.BlockSpec(shape, lambda i, _n=len(shape): (0,) * _n)

    x_spec = pl.BlockSpec((None, T * _SUB, D_in), lambda i: (i, 0, 0))
    in_specs = [x_spec]
    for (w_ih_t, w_hh_t, b) in params["lstm"]:
        in_specs += [whole(w_ih_t.shape), whole(w_hh_t.shape), whole((1, 4 * H))]
    in_specs += [whole(params["lin_w"].shape),
                 pl.BlockSpec(memory_space=pltpu.MemorySpace.SMEM)]

    out_spec = pl.BlockSpec((None, T * _SUB, 1), lambda i: (i, 0, 0))

    y_blk = pl.pallas_call(
        _make_seq2seq_kernel(num_layers, T, H),
        out_shape=jax.ShapeDtypeStruct((n_blk, T * _SUB, 1), jnp.float32),
        grid=(n_blk,),
        in_specs=in_specs,
        out_specs=out_spec,
        scratch_shapes=[
            pltpu.VMEM((T * _SUB, 4 * H), jnp.float32),  # hoisted x-path gates
            pltpu.VMEM((T * _SUB, H), jnp.float32),      # layer activations
        ],
        compiler_params=pltpu.CompilerParams(
            dimension_semantics=("parallel",),
            vmem_limit_bytes=32 * 1024 * 1024),
    )(*flat_inputs)

    # (n_blk, T*8, 1) -> (B, T, 1) batch_first (tiny glue).
    y = (y_blk.reshape(n_blk, T, _SUB)
         .transpose(0, 2, 1)           # (n_blk, 8, T)
         .reshape(B_pad, T)[:B])
    return y[..., None]


# ----------------------------------------------------------------------------
# Pure-JAX reference (lax.scan LSTM), PyTorch gate order i, f, g, o.
# ----------------------------------------------------------------------------
def reference_forward(x_bf, params, num_layers):
    x_tm = jnp.transpose(x_bf, (1, 0, 2))
    h_seq = x_tm
    B = x_bf.shape[0]
    for layer in range(num_layers):
        w_ih_t, w_hh_t, b = params["lstm"][layer]
        H = w_hh_t.shape[0]

        def step(carry, x_t):
            h, c = carry
            gates = x_t @ w_ih_t + h @ w_hh_t + b
            i = jax.nn.sigmoid(gates[:, 0 * H:1 * H])
            f = jax.nn.sigmoid(gates[:, 1 * H:2 * H])
            g = jnp.tanh(gates[:, 2 * H:3 * H])
            o = jax.nn.sigmoid(gates[:, 3 * H:4 * H])
            c_new = f * c + i * g
            h_new = o * jnp.tanh(c_new)
            return (h_new, c_new), h_new

        init = (jnp.zeros((B, H), jnp.float32), jnp.zeros((B, H), jnp.float32))
        _, h_seq = jax.lax.scan(step, init, h_seq)
    y = h_seq @ params["lin_w"].T + params["lin_b"]
    return jnp.transpose(y, (1, 0, 2))


# ----------------------------------------------------------------------------
# Deterministic parameter init (shapes per nn.LSTM / nn.Linear).
# ----------------------------------------------------------------------------
def init_params(key, input_size, hidden_size, num_layers):
    H = hidden_size
    k = 1.0 / jnp.sqrt(jnp.float32(H))
    params = {"lstm": []}
    for layer in range(num_layers):
        d_in = input_size if layer == 0 else H
        key, k1, k2, k3, k4 = jax.random.split(key, 5)
        w_ih = jax.random.uniform(k1, (4 * H, d_in), jnp.float32, -k, k)
        w_hh = jax.random.uniform(k2, (4 * H, H), jnp.float32, -k, k)
        b_ih = jax.random.uniform(k3, (4 * H,), jnp.float32, -k, k)
        b_hh = jax.random.uniform(k4, (4 * H,), jnp.float32, -k, k)
        # Pre-transpose for the kernel; combine biases (same semantics).
        params["lstm"].append((w_ih.T, w_hh.T, b_ih + b_hh))
    key, k5, k6 = jax.random.split(key, 3)
    lin_w = jax.random.uniform(k5, (1, H), jnp.float32, -k, k)
    lin_b = jax.random.uniform(k6, (1,), jnp.float32, -k, k)
    params["lin_w"] = lin_w              # (1, H) row, PyTorch Linear layout
    params["lin_b"] = lin_b              # (1,)
    return params


if __name__ == "__main__":
    input_size, hidden_size, num_layers = 4, 32, 2
    batch, seq = 2, 8

    key = jax.random.PRNGKey(0)
    key, pkey, xkey = jax.random.split(key, 3)
    params = init_params(pkey, input_size, hidden_size, num_layers)
    x = jax.random.normal(xkey, (batch, seq, input_size), jnp.float32)

    out = seq2seq_b_forward(x, params, num_layers)
    out = jax.block_until_ready(out)

    ref = reference_forward(x, params, num_layers)
    assert out.shape == (batch, seq, 1), out.shape
    assert jnp.allclose(out, ref, rtol=1e-4, atol=1e-5), (
        float(jnp.max(jnp.abs(out - ref))))

    print("KERNEL_OK")
</pallas_src>

<mosaic_0001>
module attributes {stable_mosaic.version = 11 : i64} {
  func.func @kernel(%arg0: i32, %arg1: memref<1x64x4xf32, #tpu.memory_space<vmem>>, %arg2: memref<4x128xf32, #tpu.memory_space<vmem>>, %arg3: memref<32x128xf32, #tpu.memory_space<vmem>>, %arg4: memref<1x128xf32, #tpu.memory_space<vmem>>, %arg5: memref<32x128xf32, #tpu.memory_space<vmem>>, %arg6: memref<32x128xf32, #tpu.memory_space<vmem>>, %arg7: memref<1x128xf32, #tpu.memory_space<vmem>>, %arg8: memref<1x32xf32, #tpu.memory_space<vmem>>, %arg9: memref<1xf32, #tpu.memory_space<smem>>, %arg10: memref<1x64x1xf32, #tpu.memory_space<vmem>>, %arg11: memref<64x128xf32, #tpu.memory_space<vmem>>, %arg12: memref<64x32xf32, #tpu.memory_space<vmem>>) attributes {dimension_semantics = [#tpu.dimension_semantics<parallel>], iteration_bounds = array<i64: 1>, scalar_prefetch = 0 : i64, scratch_operands = 2 : i64, tpu.core_type = #tpu.core_type<tc>, window_params = [{transform_indices = @transform_0, window_bounds = array<i64: 1, 64, 4>}, {pipeline_mode = #tpu.pipeline_mode<synchronous>, transform_indices = @transform_1, window_bounds = array<i64: 4, 128>}, {pipeline_mode = #tpu.pipeline_mode<synchronous>, transform_indices = @transform_2, window_bounds = array<i64: 32, 128>}, {pipeline_mode = #tpu.pipeline_mode<synchronous>, transform_indices = @transform_3, window_bounds = array<i64: 1, 128>}, {pipeline_mode = #tpu.pipeline_mode<synchronous>, transform_indices = @transform_4, window_bounds = array<i64: 32, 128>}, {pipeline_mode = #tpu.pipeline_mode<synchronous>, transform_indices = @transform_5, window_bounds = array<i64: 32, 128>}, {pipeline_mode = #tpu.pipeline_mode<synchronous>, transform_indices = @transform_6, window_bounds = array<i64: 1, 128>}, {pipeline_mode = #tpu.pipeline_mode<synchronous>, transform_indices = @transform_7, window_bounds = array<i64: 1, 32>}, {transform_indices = @transform_8, window_bounds = array<i64: 1>}, {transform_indices = @transform_9, window_bounds = array<i64: 1, 64, 1>}]} {
    %c0 = arith.constant 0 : index
    %c0_0 = arith.constant 0 : index
    %c0_1 = arith.constant 0 : index
    %0 = vector.load %arg1[%c0, %c0_0, %c0_1] : memref<1x64x4xf32, #tpu.memory_space<vmem>>, vector<1x64x4xf32>
    %1 = vector.shape_cast %0 : vector<1x64x4xf32> to vector<64x4xf32>
    %c0_2 = arith.constant 0 : index
    %c0_3 = arith.constant 0 : index
    %2 = vector.load %arg2[%c0_2, %c0_3] : memref<4x128xf32, #tpu.memory_space<vmem>>, vector<4x128xf32>
    %cst = arith.constant dense<0.000000e+00> : vector<64x128xf32>
    %3 = tpu.matmul %1, %2, %cst {dimension_numbers = #tpu.dot_dimension_numbers<[1], [0], [0], [1], [0, 0, 1, 1], [], []>} : vector<64x4xf32>, vector<4x128xf32>, vector<64x128xf32> -> vector<64x128xf32>
    %c0_4 = arith.constant 0 : index
    %c0_5 = arith.constant 0 : index
    %4 = vector.load %arg4[%c0_4, %c0_5] : memref<1x128xf32, #tpu.memory_space<vmem>>, vector<1x128xf32>
    %5 = vector.broadcast %4 : vector<1x128xf32> to vector<64x128xf32>
    %6 = arith.addf %3, %5 : vector<64x128xf32>
    %c0_6 = arith.constant 0 : index
    %c0_7 = arith.constant 0 : index
    %7 = vector.load %arg11[%c0_6, %c0_7] : memref<64x128xf32, #tpu.memory_space<vmem>>, vector<64x128xf32>
    tpu.vector_store %arg11[%c0_6, %c0_7], %6 {strides = array<i32>} : memref<64x128xf32, #tpu.memory_space<vmem>>, vector<64x128xf32>,
    %c0_8 = arith.constant 0 : index
    %c0_9 = arith.constant 0 : index
    %8 = vector.load %arg3[%c0_8, %c0_9] : memref<32x128xf32, #tpu.memory_space<vmem>>, vector<32x128xf32>
    %cst_10 = arith.constant 0.000000e+00 : f32
    %9 = vector.broadcast %cst_10 : f32 to vector<8x32xf32>
    %c0_i32 = arith.constant 0 : i32
    %c8_i32 = arith.constant 8 : i32
    %10 = arith.muli %c0_i32, %c8_i32 : i32
    %11 = tpu.assume_multiple %10, 8 : i32
    %12 = arith.index_cast %11 : i32 to index
    %c0_11 = arith.constant 0 : index
    %13 = vector.load %arg11[%12, %c0_11] : memref<64x128xf32, #tpu.memory_space<vmem>>, vector<8x128xf32>
    %cst_12 = arith.constant dense<0.000000e+00> : vector<8x128xf32>
    %14 = tpu.matmul %9, %8, %cst_12 {dimension_numbers = #tpu.dot_dimension_numbers<[1], [0], [0], [1], [0, 0, 1, 1], [], []>} : vector<8x32xf32>, vector<32x128xf32>, vector<8x128xf32> -> vector<8x128xf32>
    %15 = arith.addf %13, %14 : vector<8x128xf32>
    %16 = arith.negf %15 : vector<8x128xf32>
    %17 = math.exp %16 : vector<8x128xf32>
    %cst_13 = arith.constant 1.000000e+00 : f32
    %18 = vector.broadcast %cst_13 : f32 to vector<8x128xf32>
    %19 = arith.addf %18, %17 : vector<8x128xf32>
    %20 = arith.divf %18, %19 : vector<8x128xf32>
    %21 = math.tanh %15 : vector<8x128xf32>
    %22 = vector.extract_strided_slice %20 {offsets = [0, 0], sizes = [8, 32], strides = [1, 1]} : vector<8x128xf32> to vector<8x32xf32>
    %23 = vector.extract_strided_slice %20 {offsets = [0, 32], sizes = [8, 32], strides = [1, 1]} : vector<8x128xf32> to vector<8x32xf32>
    %24 = vector.extract_strided_slice %21 {offsets = [0, 64], sizes = [8, 32], strides = [1, 1]} : vector<8x128xf32> to vector<8x32xf32>
    %25 = vector.extract_strided_slice %20 {offsets = [0, 96], sizes = [8, 32], strides = [1, 1]} : vector<8x128xf32> to vector<8x32xf32>
    %26 = arith.mulf %23, %9 : vector<8x32xf32>
    %27 = arith.mulf %22, %24 : vector<8x32xf32>
    %28 = arith.addf %26, %27 : vector<8x32xf32>
    %29 = math.tanh %28 : vector<8x32xf32>
    %30 = arith.mulf %25, %29 : vector<8x32xf32>
    %31 = arith.index_cast %11 : i32 to index
    %c0_14 = arith.constant 0 : index
    %32 = vector.load %arg12[%31, %c0_14] : memref<64x32xf32, #tpu.memory_space<vmem>>, vector<8x32xf32>
    tpu.vector_store %arg12[%31, %c0_14], %30 {strides = array<i32>} : memref<64x32xf32, #tpu.memory_space<vmem>>, vector<8x32xf32>,
    %c1_i32 = arith.constant 1 : i32
    %c8_i32_15 = arith.constant 8 : i32
    %33 = arith.muli %c1_i32, %c8_i32_15 : i32
    %34 = tpu.assume_multiple %33, 8 : i32
    %35 = arith.index_cast %34 : i32 to index
    %c0_16 = arith.constant 0 : index
    %36 = vector.load %arg11[%35, %c0_16] : memref<64x128xf32, #tpu.memory_space<vmem>>, vector<8x128xf32>
    %cst_17 = arith.constant dense<0.000000e+00> : vector<8x128xf32>
    %37 = tpu.matmul %30, %8, %cst_17 {dimension_numbers = #tpu.dot_dimension_numbers<[1], [0], [0], [1], [0, 0, 1, 1], [], []>} : vector<8x32xf32>, vector<32x128xf32>, vector<8x128xf32> -> vector<8x128xf32>
    %38 = arith.addf %36, %37 : vector<8x128xf32>
    %39 = arith.negf %38 : vector<8x128xf32>
    %40 = math.exp %39 : vector<8x128xf32>
    %cst_18 = arith.constant 1.000000e+00 : f32
    %41 = vector.broadcast %cst_18 : f32 to vector<8x128xf32>
    %42 = arith.addf %41, %40 : vector<8x128xf32>
    %43 = arith.divf %41, %42 : vector<8x128xf32>
    %44 = math.tanh %38 : vector<8x128xf32>
    %45 = vector.extract_strided_slice %43 {offsets = [0, 0], sizes = [8, 32], strides = [1, 1]} : vector<8x128xf32> to vector<8x32xf32>
    %46 = vector.extract_strided_slice %43 {offsets = [0, 32], sizes = [8, 32], strides = [1, 1]} : vector<8x128xf32> to vector<8x32xf32>
    %47 = vector.extract_strided_slice %44 {offsets = [0, 64], sizes = [8, 32], strides = [1, 1]} : vector<8x128xf32> to vector<8x32xf32>
    %48 = vector.extract_strided_slice %43 {offsets = [0, 96], sizes = [8, 32], strides = [1, 1]} : vector<8x128xf32> to vector<8x32xf32>
    %49 = arith.mulf %46, %28 : vector<8x32xf32>
    %50 = arith.mulf %45, %47 : vector<8x32xf32>
    %51 = arith.addf %49, %50 : vector<8x32xf32>
    %52 = math.tanh %51 : vector<8x32xf32>
    %53 = arith.mulf %48, %52 : vector<8x32xf32>
    %54 = arith.index_cast %34 : i32 to index
    %c0_19 = arith.constant 0 : index
    %55 = vector.load %arg12[%54, %c0_19] : memref<64x32xf32, #tpu.memory_space<vmem>>, vector<8x32xf32>
    tpu.vector_store %arg12[%54, %c0_19], %53 {strides = array<i32>} : memref<64x32xf32, #tpu.memory_space<vmem>>, vector<8x32xf32>,
    %c2_i32 = arith.constant 2 : i32
    %c8_i32_20 = arith.constant 8 : i32
    %56 = arith.muli %c2_i32, %c8_i32_20 : i32
    %57 = tpu.assume_multiple %56, 8 : i32
    %58 = arith.index_cast %57 : i32 to index
    %c0_21 = arith.constant 0 : index
    %59 = vector.load %arg11[%58, %c0_21] : memref<64x128xf32, #tpu.memory_space<vmem>>, vector<8x128xf32>
    %cst_22 = arith.constant dense<0.000000e+00> : vector<8x128xf32>
    %60 = tpu.matmul %53, %8, %cst_22 {dimension_numbers = #tpu.dot_dimension_numbers<[1], [0], [0], [1], [0, 0, 1, 1], [], []>} : vector<8x32xf32>, vector<32x128xf32>, vector<8x128xf32> -> vector<8x128xf32>
    %61 = arith.addf %59, %60 : vector<8x128xf32>
    %62 = arith.negf %61 : vector<8x128xf32>
    %63 = math.exp %62 : vector<8x128xf32>
    %cst_23 = arith.constant 1.000000e+00 : f32
    %64 = vector.broadcast %cst_23 : f32 to vector<8x128xf32>
    %65 = arith.addf %64, %63 : vector<8x128xf32>
    %66 = arith.divf %64, %65 : vector<8x128xf32>
    %67 = math.tanh %61 : vector<8x128xf32>
    %68 = vector.extract_strided_slice %66 {offsets = [0, 0], sizes = [8, 32], strides = [1, 1]} : vector<8x128xf32> to vector<8x32xf32>
    %69 = vector.extract_strided_slice %66 {offsets = [0, 32], sizes = [8, 32], strides = [1, 1]} : vector<8x128xf32> to vector<8x32xf32>
    %70 = vector.extract_strided_slice %67 {offsets = [0, 64], sizes = [8, 32], strides = [1, 1]} : vector<8x128xf32> to vector<8x32xf32>
    %71 = vector.extract_strided_slice %66 {offsets = [0, 96], sizes = [8, 32], strides = [1, 1]} : vector<8x128xf32> to vector<8x32xf32>
    %72 = arith.mulf %69, %51 : vector<8x32xf32>
    %73 = arith.mulf %68, %70 : vector<8x32xf32>
    %74 = arith.addf %72, %73 : vector<8x32xf32>
    %75 = math.tanh %74 : vector<8x32xf32>
    %76 = arith.mulf %71, %75 : vector<8x32xf32>
    %77 = arith.index_cast %57 : i32 to index
    %c0_24 = arith.constant 0 : index
    %78 = vector.load %arg12[%77, %c0_24] : memref<64x32xf32, #tpu.memory_space<vmem>>, vector<8x32xf32>
    tpu.vector_store %arg12[%77, %c0_24], %76 {strides = array<i32>} : memref<64x32xf32, #tpu.memory_space<vmem>>, vector<8x32xf32>,
    %c3_i32 = arith.constant 3 : i32
    %c8_i32_25 = arith.constant 8 : i32
    %79 = arith.muli %c3_i32, %c8_i32_25 : i32
    %80 = tpu.assume_multiple %79, 8 : i32
    %81 = arith.index_cast %80 : i32 to index
    %c0_26 = arith.constant 0 : index
    %82 = vector.load %arg11[%81, %c0_26] : memref<64x128xf32, #tpu.memory_space<vmem>>, vector<8x128xf32>
    %cst_27 = arith.constant dense<0.000000e+00> : vector<8x128xf32>
    %83 = tpu.matmul %76, %8, %cst_27 {dimension_numbers = #tpu.dot_dimension_numbers<[1], [0], [0], [1], [0, 0, 1, 1], [], []>} : vector<8x32xf32>, vector<32x128xf32>, vector<8x128xf32> -> vector<8x128xf32>
    %84 = arith.addf %82, %83 : vector<8x128xf32>
    %85 = arith.negf %84 : vector<8x128xf32>
    %86 = math.exp %85 : vector<8x128xf32>
    %cst_28 = arith.constant 1.000000e+00 : f32
    %87 = vector.broadcast %cst_28 : f32 to vector<8x128xf32>
    %88 = arith.addf %87, %86 : vector<8x128xf32>
    %89 = arith.divf %87, %88 : vector<8x128xf32>
    %90 = math.tanh %84 : vector<8x128xf32>
    %91 = vector.extract_strided_slice %89 {offsets = [0, 0], sizes = [8, 32], strides = [1, 1]} : vector<8x128xf32> to vector<8x32xf32>
    %92 = vector.extract_strided_slice %89 {offsets = [0, 32], sizes = [8, 32], strides = [1, 1]} : vector<8x128xf32> to vector<8x32xf32>
    %93 = vector.extract_strided_slice %90 {offsets = [0, 64], sizes = [8, 32], strides = [1, 1]} : vector<8x128xf32> to vector<8x32xf32>
    %94 = vector.extract_strided_slice %89 {offsets = [0, 96], sizes = [8, 32], strides = [1, 1]} : vector<8x128xf32> to vector<8x32xf32>
    %95 = arith.mulf %92, %74 : vector<8x32xf32>
    %96 = arith.mulf %91, %93 : vector<8x32xf32>
    %97 = arith.addf %95, %96 : vector<8x32xf32>
    %98 = math.tanh %97 : vector<8x32xf32>
    %99 = arith.mulf %94, %98 : vector<8x32xf32>
    %100 = arith.index_cast %80 : i32 to index
    %c0_29 = arith.constant 0 : index
    %101 = vector.load %arg12[%100, %c0_29] : memref<64x32xf32, #tpu.memory_space<vmem>>, vector<8x32xf32>
    tpu.vector_store %arg12[%100, %c0_29], %99 {strides = array<i32>} : memref<64x32xf32, #tpu.memory_space<vmem>>, vector<8x32xf32>,
    %c4_i32 = arith.constant 4 : i32
    %c8_i32_30 = arith.constant 8 : i32
    %102 = arith.muli %c4_i32, %c8_i32_30 : i32
    %103 = tpu.assume_multiple %102, 8 : i32
    %104 = arith.index_cast %103 : i32 to index
    %c0_31 = arith.constant 0 : index
    %105 = vector.load %arg11[%104, %c0_31] : memref<64x128xf32, #tpu.memory_space<vmem>>, vector<8x128xf32>
    %cst_32 = arith.constant dense<0.000000e+00> : vector<8x128xf32>
    %106 = tpu.matmul %99, %8, %cst_32 {dimension_numbers = #tpu.dot_dimension_numbers<[1], [0], [0], [1], [0, 0, 1, 1], [], []>} : vector<8x32xf32>, vector<32x128xf32>, vector<8x128xf32> -> vector<8x128xf32>
    %107 = arith.addf %105, %106 : vector<8x128xf32>
    %108 = arith.negf %107 : vector<8x128xf32>
    %109 = math.exp %108 : vector<8x128xf32>
    %cst_33 = arith.constant 1.000000e+00 : f32
    %110 = vector.broadcast %cst_33 : f32 to vector<8x128xf32>
    %111 = arith.addf %110, %109 : vector<8x128xf32>
    %112 = arith.divf %110, %111 : vector<8x128xf32>
    %113 = math.tanh %107 : vector<8x128xf32>
    %114 = vector.extract_strided_slice %112 {offsets = [0, 0], sizes = [8, 32], strides = [1, 1]} : vector<8x128xf32> to vector<8x32xf32>
    %115 = vector.extract_strided_slice %112 {offsets = [0, 32], sizes = [8, 32], strides = [1, 1]} : vector<8x128xf32> to vector<8x32xf32>
    %116 = vector.extract_strided_slice %113 {offsets = [0, 64], sizes = [8, 32], strides = [1, 1]} : vector<8x128xf32> to vector<8x32xf32>
    %117 = vector.extract_strided_slice %112 {offsets = [0, 96], sizes = [8, 32], strides = [1, 1]} : vector<8x128xf32> to vector<8x32xf32>
    %118 = arith.mulf %115, %97 : vector<8x32xf32>
    %119 = arith.mulf %114, %116 : vector<8x32xf32>
    %120 = arith.addf %118, %119 : vector<8x32xf32>
    %121 = math.tanh %120 : vector<8x32xf32>
    %122 = arith.mulf %117, %121 : vector<8x32xf32>
    %123 = arith.index_cast %103 : i32 to index
    %c0_34 = arith.constant 0 : index
    %124 = vector.load %arg12[%123, %c0_34] : memref<64x32xf32, #tpu.memory_space<vmem>>, vector<8x32xf32>
    tpu.vector_store %arg12[%123, %c0_34], %122 {strides = array<i32>} : memref<64x32xf32, #tpu.memory_space<vmem>>, vector<8x32xf32>,
    %c5_i32 = arith.constant 5 : i32
    %c8_i32_35 = arith.constant 8 : i32
    %125 = arith.muli %c5_i32, %c8_i32_35 : i32
    %126 = tpu.assume_multiple %125, 8 : i32
    %127 = arith.index_cast %126 : i32 to index
    %c0_36 = arith.constant 0 : index
    %128 = vector.load %arg11[%127, %c0_36] : memref<64x128xf32, #tpu.memory_space<vmem>>, vector<8x128xf32>
    %cst_37 = arith.constant dense<0.000000e+00> : vector<8x128xf32>
    %129 = tpu.matmul %122, %8, %cst_37 {dimension_numbers = #tpu.dot_dimension_numbers<[1], [0], [0], [1], [0, 0, 1, 1], [], []>} : vector<8x32xf32>, vector<32x128xf32>, vector<8x128xf32> -> vector<8x128xf32>
    %130 = arith.addf %128, %129 : vector<8x128xf32>
    %131 = arith.negf %130 : vector<8x128xf32>
    %132 = math.exp %131 : vector<8x128xf32>
    %cst_38 = arith.constant 1.000000e+00 : f32
    %133 = vector.broadcast %cst_38 : f32 to vector<8x128xf32>
    %134 = arith.addf %133, %132 : vector<8x128xf32>
    %135 = arith.divf %133, %134 : vector<8x128xf32>
    %136 = math.tanh %130 : vector<8x128xf32>
    %137 = vector.extract_strided_slice %135 {offsets = [0, 0], sizes = [8, 32], strides = [1, 1]} : vector<8x128xf32> to vector<8x32xf32>
    %138 = vector.extract_strided_slice %135 {offsets = [0, 32], sizes = [8, 32], strides = [1, 1]} : vector<8x128xf32> to vector<8x32xf32>
    %139 = vector.extract_strided_slice %136 {offsets = [0, 64], sizes = [8, 32], strides = [1, 1]} : vector<8x128xf32> to vector<8x32xf32>
    %140 = vector.extract_strided_slice %135 {offsets = [0, 96], sizes = [8, 32], strides = [1, 1]} : vector<8x128xf32> to vector<8x32xf32>
    %141 = arith.mulf %138, %120 : vector<8x32xf32>
    %142 = arith.mulf %137, %139 : vector<8x32xf32>
    %143 = arith.addf %141, %142 : vector<8x32xf32>
    %144 = math.tanh %143 : vector<8x32xf32>
    %145 = arith.mulf %140, %144 : vector<8x32xf32>
    %146 = arith.index_cast %126 : i32 to index
    %c0_39 = arith.constant 0 : index
    %147 = vector.load %arg12[%146, %c0_39] : memref<64x32xf32, #tpu.memory_space<vmem>>, vector<8x32xf32>
    tpu.vector_store %arg12[%146, %c0_39], %145 {strides = array<i32>} : memref<64x32xf32, #tpu.memory_space<vmem>>, vector<8x32xf32>,
    %c6_i32 = arith.constant 6 : i32
    %c8_i32_40 = arith.constant 8 : i32
    %148 = arith.muli %c6_i32, %c8_i32_40 : i32
    %149 = tpu.assume_multiple %148, 8 : i32
    %150 = arith.index_cast %149 : i32 to index
    %c0_41 = arith.constant 0 : index
    %151 = vector.load %arg11[%150, %c0_41] : memref<64x128xf32, #tpu.memory_space<vmem>>, vector<8x128xf32>
    %cst_42 = arith.constant dense<0.000000e+00> : vector<8x128xf32>
    %152 = tpu.matmul %145, %8, %cst_42 {dimension_numbers = #tpu.dot_dimension_numbers<[1], [0], [0], [1], [0, 0, 1, 1], [], []>} : vector<8x32xf32>, vector<32x128xf32>, vector<8x128xf32> -> vector<8x128xf32>
    %153 = arith.addf %151, %152 : vector<8x128xf32>
    %154 = arith.negf %153 : vector<8x128xf32>
    %155 = math.exp %154 : vector<8x128xf32>
    %cst_43 = arith.constant 1.000000e+00 : f32
    %156 = vector.broadcast %cst_43 : f32 to vector<8x128xf32>
    %157 = arith.addf %156, %155 : vector<8x128xf32>
    %158 = arith.divf %156, %157 : vector<8x128xf32>
    %159 = math.tanh %153 : vector<8x128xf32>
    %160 = vector.extract_strided_slice %158 {offsets = [0, 0], sizes = [8, 32], strides = [1, 1]} : vector<8x128xf32> to vector<8x32xf32>
    %161 = vector.extract_strided_slice %158 {offsets = [0, 32], sizes = [8, 32], strides = [1, 1]} : vector<8x128xf32> to vector<8x32xf32>
    %162 = vector.extract_strided_slice %159 {offsets = [0, 64], sizes = [8, 32], strides = [1, 1]} : vector<8x128xf32> to vector<8x32xf32>
    %163 = vector.extract_strided_slice %158 {offsets = [0, 96], sizes = [8, 32], strides = [1, 1]} : vector<8x128xf32> to vector<8x32xf32>
    %164 = arith.mulf %161, %143 : vector<8x32xf32>
    %165 = arith.mulf %160, %162 : vector<8x32xf32>
    %166 = arith.addf %164, %165 : vector<8x32xf32>
    %167 = math.tanh %166 : vector<8x32xf32>
    %168 = arith.mulf %163, %167 : vector<8x32xf32>
    %169 = arith.index_cast %149 : i32 to index
    %c0_44 = arith.constant 0 : index
    %170 = vector.load %arg12[%169, %c0_44] : memref<64x32xf32, #tpu.memory_space<vmem>>, vector<8x32xf32>
    tpu.vector_store %arg12[%169, %c0_44], %168 {strides = array<i32>} : memref<64x32xf32, #tpu.memory_space<vmem>>, vector<8x32xf32>,
    %c7_i32 = arith.constant 7 : i32
    %c8_i32_45 = arith.constant 8 : i32
    %171 = arith.muli %c7_i32, %c8_i32_45 : i32
    %172 = tpu.assume_multiple %171, 8 : i32
    %173 = arith.index_cast %172 : i32 to index
    %c0_46 = arith.constant 0 : index
    %174 = vector.load %arg11[%173, %c0_46] : memref<64x128xf32, #tpu.memory_space<vmem>>, vector<8x128xf32>
    %cst_47 = arith.constant dense<0.000000e+00> : vector<8x128xf32>
    %175 = tpu.matmul %168, %8, %cst_47 {dimension_numbers = #tpu.dot_dimension_numbers<[1], [0], [0], [1], [0, 0, 1, 1], [], []>} : vector<8x32xf32>, vector<32x128xf32>, vector<8x128xf32> -> vector<8x128xf32>
    %176 = arith.addf %174, %175 : vector<8x128xf32>
    %177 = arith.negf %176 : vector<8x128xf32>
    %178 = math.exp %177 : vector<8x128xf32>
    %cst_48 = arith.constant 1.000000e+00 : f32
    %179 = vector.broadcast %cst_48 : f32 to vector<8x128xf32>
    %180 = arith.addf %179, %178 : vector<8x128xf32>
    %181 = arith.divf %179, %180 : vector<8x128xf32>
    %182 = math.tanh %176 : vector<8x128xf32>
    %183 = vector.extract_strided_slice %181 {offsets = [0, 0], sizes = [8, 32], strides = [1, 1]} : vector<8x128xf32> to vector<8x32xf32>
    %184 = vector.extract_strided_slice %181 {offsets = [0, 32], sizes = [8, 32], strides = [1, 1]} : vector<8x128xf32> to vector<8x32xf32>
    %185 = vector.extract_strided_slice %182 {offsets = [0, 64], sizes = [8, 32], strides = [1, 1]} : vector<8x128xf32> to vector<8x32xf32>
    %186 = vector.extract_strided_slice %181 {offsets = [0, 96], sizes = [8, 32], strides = [1, 1]} : vector<8x128xf32> to vector<8x32xf32>
    %187 = arith.mulf %184, %166 : vector<8x32xf32>
    %188 = arith.mulf %183, %185 : vector<8x32xf32>
    %189 = arith.addf %187, %188 : vector<8x32xf32>
    %190 = math.tanh %189 : vector<8x32xf32>
    %191 = arith.mulf %186, %190 : vector<8x32xf32>
    %192 = arith.index_cast %172 : i32 to index
    %c0_49 = arith.constant 0 : index
    %193 = vector.load %arg12[%192, %c0_49] : memref<64x32xf32, #tpu.memory_space<vmem>>, vector<8x32xf32>
    tpu.vector_store %arg12[%192, %c0_49], %191 {strides = array<i32>} : memref<64x32xf32, #tpu.memory_space<vmem>>, vector<8x32xf32>,
    %c8_i32_50 = arith.constant 8 : i32
    %c0_51 = arith.constant 0 : index
    %c0_52 = arith.constant 0 : index
    %194 = vector.load %arg12[%c0_51, %c0_52] : memref<64x32xf32, #tpu.memory_space<vmem>>, vector<64x32xf32>
    %c0_53 = arith.constant 0 : index
    %c0_54 = arith.constant 0 : index
    %195 = vector.load %arg5[%c0_53, %c0_54] : memref<32x128xf32, #tpu.memory_space<vmem>>, vector<32x128xf32>
    %cst_55 = arith.constant dense<0.000000e+00> : vector<64x128xf32>
    %196 = tpu.matmul %194, %195, %cst_55 {dimension_numbers = #tpu.dot_dimension_numbers<[1], [0], [0], [1], [0, 0, 1, 1], [], []>} : vector<64x32xf32>, vector<32x128xf32>, vector<64x128xf32> -> vector<64x128xf32>
    %c0_56 = arith.constant 0 : index
    %c0_57 = arith.constant 0 : index
    %197 = vector.load %arg7[%c0_56, %c0_57] : memref<1x128xf32, #tpu.memory_space<vmem>>, vector<1x128xf32>
    %198 = vector.broadcast %197 : vector<1x128xf32> to vector<64x128xf32>
    %199 = arith.addf %196, %198 : vector<64x128xf32>
    %c0_58 = arith.constant 0 : index
    %c0_59 = arith.constant 0 : index
    %200 = vector.load %arg11[%c0_58, %c0_59] : memref<64x128xf32, #tpu.memory_space<vmem>>, vector<64x128xf32>
    tpu.vector_store %arg11[%c0_58, %c0_59], %199 {strides = array<i32>} : memref<64x128xf32, #tpu.memory_space<vmem>>, vector<64x128xf32>,
    %c0_60 = arith.constant 0 : index
    %c0_61 = arith.constant 0 : index
    %201 = vector.load %arg6[%c0_60, %c0_61] : memref<32x128xf32, #tpu.memory_space<vmem>>, vector<32x128xf32>
    %cst_62 = arith.constant 0.000000e+00 : f32
    %202 = vector.broadcast %cst_62 : f32 to vector<8x32xf32>
    %c0_i32_63 = arith.constant 0 : i32
    %c8_i32_64 = arith.constant 8 : i32
    %203 = arith.muli %c0_i32_63, %c8_i32_64 : i32
    %204 = tpu.assume_multiple %203, 8 : i32
    %205 = arith.index_cast %204 : i32 to index
    %c0_65 = arith.constant 0 : index
    %206 = vector.load %arg11[%205, %c0_65] : memref<64x128xf32, #tpu.memory_space<vmem>>, vector<8x128xf32>
    %cst_66 = arith.constant dense<0.000000e+00> : vector<8x128xf32>
    %207 = tpu.matmul %202, %201, %cst_66 {dimension_numbers = #tpu.dot_dimension_numbers<[1], [0], [0], [1], [0, 0, 1, 1], [], []>} : vector<8x32xf32>, vector<32x128xf32>, vector<8x128xf32> -> vector<8x128xf32>
    %208 = arith.addf %206, %207 : vector<8x128xf32>
    %209 = arith.negf %208 : vector<8x128xf32>
    %210 = math.exp %209 : vector<8x128xf32>
    %cst_67 = arith.constant 1.000000e+00 : f32
    %211 = vector.broadcast %cst_67 : f32 to vector<8x128xf32>
    %212 = arith.addf %211, %210 : vector<8x128xf32>
    %213 = arith.divf %211, %212 : vector<8x128xf32>
    %214 = math.tanh %208 : vector<8x128xf32>
    %215 = vector.extract_strided_slice %213 {offsets = [0, 0], sizes = [8, 32], strides = [1, 1]} : vector<8x128xf32> to vector<8x32xf32>
    %216 = vector.extract_strided_slice %213 {offsets = [0, 32], sizes = [8, 32], strides = [1, 1]} : vector<8x128xf32> to vector<8x32xf32>
    %217 = vector.extract_strided_slice %214 {offsets = [0, 64], sizes = [8, 32], strides = [1, 1]} : vector<8x128xf32> to vector<8x32xf32>
    %218 = vector.extract_strided_slice %213 {offsets = [0, 96], sizes = [8, 32], strides = [1, 1]} : vector<8x128xf32> to vector<8x32xf32>
    %219 = arith.mulf %216, %202 : vector<8x32xf32>
    %220 = arith.mulf %215, %217 : vector<8x32xf32>
    %221 = arith.addf %219, %220 : vector<8x32xf32>
    %222 = math.tanh %221 : vector<8x32xf32>
    %223 = arith.mulf %218, %222 : vector<8x32xf32>
    %224 = arith.index_cast %204 : i32 to index
    %c0_68 = arith.constant 0 : index
    %225 = vector.load %arg12[%224, %c0_68] : memref<64x32xf32, #tpu.memory_space<vmem>>, vector<8x32xf32>
    tpu.vector_store %arg12[%224, %c0_68], %223 {strides = array<i32>} : memref<64x32xf32, #tpu.memory_space<vmem>>, vector<8x32xf32>,
    %c1_i32_69 = arith.constant 1 : i32
    %c8_i32_70 = arith.constant 8 : i32
    %226 = arith.muli %c1_i32_69, %c8_i32_70 : i32
    %227 = tpu.assume_multiple %226, 8 : i32
    %228 = arith.index_cast %227 : i32 to index
    %c0_71 = arith.constant 0 : index
    %229 = vector.load %arg11[%228, %c0_71] : memref<64x128xf32, #tpu.memory_space<vmem>>, vector<8x128xf32>
    %cst_72 = arith.constant dense<0.000000e+00> : vector<8x128xf32>
    %230 = tpu.matmul %223, %201, %cst_72 {dimension_numbers = #tpu.dot_dimension_numbers<[1], [0], [0], [1], [0, 0, 1, 1], [], []>} : vector<8x32xf32>, vector<32x128xf32>, vector<8x128xf32> -> vector<8x128xf32>
    %231 = arith.addf %229, %230 : vector<8x128xf32>
    %232 = arith.negf %231 : vector<8x128xf32>
    %233 = math.exp %232 : vector<8x128xf32>
    %cst_73 = arith.constant 1.000000e+00 : f32
    %234 = vector.broadcast %cst_73 : f32 to vector<8x128xf32>
    %235 = arith.addf %234, %233 : vector<8x128xf32>
    %236 = arith.divf %234, %235 : vector<8x128xf32>
    %237 = math.tanh %231 : vector<8x128xf32>
    %238 = vector.extract_strided_slice %236 {offsets = [0, 0], sizes = [8, 32], strides = [1, 1]} : vector<8x128xf32> to vector<8x32xf32>
    %239 = vector.extract_strided_slice %236 {offsets = [0, 32], sizes = [8, 32], strides = [1, 1]} : vector<8x128xf32> to vector<8x32xf32>
    %240 = vector.extract_strided_slice %237 {offsets = [0, 64], sizes = [8, 32], strides = [1, 1]} : vector<8x128xf32> to vector<8x32xf32>
    %241 = vector.extract_strided_slice %236 {offsets = [0, 96], sizes = [8, 32], strides = [1, 1]} : vector<8x128xf32> to vector<8x32xf32>
    %242 = arith.mulf %239, %221 : vector<8x32xf32>
    %243 = arith.mulf %238, %240 : vector<8x32xf32>
    %244 = arith.addf %242, %243 : vector<8x32xf32>
    %245 = math.tanh %244 : vector<8x32xf32>
    %246 = arith.mulf %241, %245 : vector<8x32xf32>
    %247 = arith.index_cast %227 : i32 to index
    %c0_74 = arith.constant 0 : index
    %248 = vector.load %arg12[%247, %c0_74] : memref<64x32xf32, #tpu.memory_space<vmem>>, vector<8x32xf32>
    tpu.vector_store %arg12[%247, %c0_74], %246 {strides = array<i32>} : memref<64x32xf32, #tpu.memory_space<vmem>>, vector<8x32xf32>,
    %c2_i32_75 = arith.constant 2 : i32
    %c8_i32_76 = arith.constant 8 : i32
    %249 = arith.muli %c2_i32_75, %c8_i32_76 : i32
    %250 = tpu.assume_multiple %249, 8 : i32
    %251 = arith.index_cast %250 : i32 to index
    %c0_77 = arith.constant 0 : index
    %252 = vector.load %arg11[%251, %c0_77] : memref<64x128xf32, #tpu.memory_space<vmem>>, vector<8x128xf32>
    %cst_78 = arith.constant dense<0.000000e+00> : vector<8x128xf32>
    %253 = tpu.matmul %246, %201, %cst_78 {dimension_numbers = #tpu.dot_dimension_numbers<[1], [0], [0], [1], [0, 0, 1, 1], [], []>} : vector<8x32xf32>, vector<32x128xf32>, vector<8x128xf32> -> vector<8x128xf32>
    %254 = arith.addf %252, %253 : vector<8x128xf32>
    %255 = arith.negf %254 : vector<8x128xf32>
    %256 = math.exp %255 : vector<8x128xf32>
    %cst_79 = arith.constant 1.000000e+00 : f32
    %257 = vector.broadcast %cst_79 : f32 to vector<8x128xf32>
    %258 = arith.addf %257, %256 : vector<8x128xf32>
    %259 = arith.divf %257, %258 : vector<8x128xf32>
    %260 = math.tanh %254 : vector<8x128xf32>
    %261 = vector.extract_strided_slice %259 {offsets = [0, 0], sizes = [8, 32], strides = [1, 1]} : vector<8x128xf32> to vector<8x32xf32>
    %262 = vector.extract_strided_slice %259 {offsets = [0, 32], sizes = [8, 32], strides = [1, 1]} : vector<8x128xf32> to vector<8x32xf32>
    %263 = vector.extract_strided_slice %260 {offsets = [0, 64], sizes = [8, 32], strides = [1, 1]} : vector<8x128xf32> to vector<8x32xf32>
    %264 = vector.extract_strided_slice %259 {offsets = [0, 96], sizes = [8, 32], strides = [1, 1]} : vector<8x128xf32> to vector<8x32xf32>
    %265 = arith.mulf %262, %244 : vector<8x32xf32>
    %266 = arith.mulf %261, %263 : vector<8x32xf32>
    %267 = arith.addf %265, %266 : vector<8x32xf32>
    %268 = math.tanh %267 : vector<8x32xf32>
    %269 = arith.mulf %264, %268 : vector<8x32xf32>
    %270 = arith.index_cast %250 : i32 to index
    %c0_80 = arith.constant 0 : index
    %271 = vector.load %arg12[%270, %c0_80] : memref<64x32xf32, #tpu.memory_space<vmem>>, vector<8x32xf32>
    tpu.vector_store %arg12[%270, %c0_80], %269 {strides = array<i32>} : memref<64x32xf32, #tpu.memory_space<vmem>>, vector<8x32xf32>,
    %c3_i32_81 = arith.constant 3 : i32
    %c8_i32_82 = arith.constant 8 : i32
    %272 = arith.muli %c3_i32_81, %c8_i32_82 : i32
    %273 = tpu.assume_multiple %272, 8 : i32
    %274 = arith.index_cast %273 : i32 to index
    %c0_83 = arith.constant 0 : index
    %275 = vector.load %arg11[%274, %c0_83] : memref<64x128xf32, #tpu.memory_space<vmem>>, vector<8x128xf32>
    %cst_84 = arith.constant dense<0.000000e+00> : vector<8x128xf32>
    %276 = tpu.matmul %269, %201, %cst_84 {dimension_numbers = #tpu.dot_dimension_numbers<[1], [0], [0], [1], [0, 0, 1, 1], [], []>} : vector<8x32xf32>, vector<32x128xf32>, vector<8x128xf32> -> vector<8x128xf32>
    %277 = arith.addf %275, %276 : vector<8x128xf32>
    %278 = arith.negf %277 : vector<8x128xf32>
    %279 = math.exp %278 : vector<8x128xf32>
    %cst_85 = arith.constant 1.000000e+00 : f32
    %280 = vector.broadcast %cst_85 : f32 to vector<8x128xf32>
    %281 = arith.addf %280, %279 : vector<8x128xf32>
    %282 = arith.divf %280, %281 : vector<8x128xf32>
    %283 = math.tanh %277 : vector<8x128xf32>
    %284 = vector.extract_strided_slice %282 {offsets = [0, 0], sizes = [8, 32], strides = [1, 1]} : vector<8x128xf32> to vector<8x32xf32>
    %285 = vector.extract_strided_slice %282 {offsets = [0, 32], sizes = [8, 32], strides = [1, 1]} : vector<8x128xf32> to vector<8x32xf32>
    %286 = vector.extract_strided_slice %283 {offsets = [0, 64], sizes = [8, 32], strides = [1, 1]} : vector<8x128xf32> to vector<8x32xf32>
    %287 = vector.extract_strided_slice %282 {offsets = [0, 96], sizes = [8, 32], strides = [1, 1]} : vector<8x128xf32> to vector<8x32xf32>
    %288 = arith.mulf %285, %267 : vector<8x32xf32>
    %289 = arith.mulf %284, %286 : vector<8x32xf32>
    %290 = arith.addf %288, %289 : vector<8x32xf32>
    %291 = math.tanh %290 : vector<8x32xf32>
    %292 = arith.mulf %287, %291 : vector<8x32xf32>
    %293 = arith.index_cast %273 : i32 to index
    %c0_86 = arith.constant 0 : index
    %294 = vector.load %arg12[%293, %c0_86] : memref<64x32xf32, #tpu.memory_space<vmem>>, vector<8x32xf32>
    tpu.vector_store %arg12[%293, %c0_86], %292 {strides = array<i32>} : memref<64x32xf32, #tpu.memory_space<vmem>>, vector<8x32xf32>,
    %c4_i32_87 = arith.constant 4 : i32
    %c8_i32_88 = arith.constant 8 : i32
    %295 = arith.muli %c4_i32_87, %c8_i32_88 : i32
    %296 = tpu.assume_multiple %295, 8 : i32
    %297 = arith.index_cast %296 : i32 to index
    %c0_89 = arith.constant 0 : index
    %298 = vector.load %arg11[%297, %c0_89] : memref<64x128xf32, #tpu.memory_space<vmem>>, vector<8x128xf32>
    %cst_90 = arith.constant dense<0.000000e+00> : vector<8x128xf32>
    %299 = tpu.matmul %292, %201, %cst_90 {dimension_numbers = #tpu.dot_dimension_numbers<[1], [0], [0], [1], [0, 0, 1, 1], [], []>} : vector<8x32xf32>, vector<32x128xf32>, vector<8x128xf32> -> vector<8x128xf32>
    %300 = arith.addf %298, %299 : vector<8x128xf32>
    %301 = arith.negf %300 : vector<8x128xf32>
    %302 = math.exp %301 : vector<8x128xf32>
    %cst_91 = arith.constant 1.000000e+00 : f32
    %303 = vector.broadcast %cst_91 : f32 to vector<8x128xf32>
    %304 = arith.addf %303, %302 : vector<8x128xf32>
    %305 = arith.divf %303, %304 : vector<8x128xf32>
    %306 = math.tanh %300 : vector<8x128xf32>
    %307 = vector.extract_strided_slice %305 {offsets = [0, 0], sizes = [8, 32], strides = [1, 1]} : vector<8x128xf32> to vector<8x32xf32>
    %308 = vector.extract_strided_slice %305 {offsets = [0, 32], sizes = [8, 32], strides = [1, 1]} : vector<8x128xf32> to vector<8x32xf32>
    %309 = vector.extract_strided_slice %306 {offsets = [0, 64], sizes = [8, 32], strides = [1, 1]} : vector<8x128xf32> to vector<8x32xf32>
    %310 = vector.extract_strided_slice %305 {offsets = [0, 96], sizes = [8, 32], strides = [1, 1]} : vector<8x128xf32> to vector<8x32xf32>
    %311 = arith.mulf %308, %290 : vector<8x32xf32>
    %312 = arith.mulf %307, %309 : vector<8x32xf32>
    %313 = arith.addf %311, %312 : vector<8x32xf32>
    %314 = math.tanh %313 : vector<8x32xf32>
    %315 = arith.mulf %310, %314 : vector<8x32xf32>
    %316 = arith.index_cast %296 : i32 to index
    %c0_92 = arith.constant 0 : index
    %317 = vector.load %arg12[%316, %c0_92] : memref<64x32xf32, #tpu.memory_space<vmem>>, vector<8x32xf32>
    tpu.vector_store %arg12[%316, %c0_92], %315 {strides = array<i32>} : memref<64x32xf32, #tpu.memory_space<vmem>>, vector<8x32xf32>,
    %c5_i32_93 = arith.constant 5 : i32
    %c8_i32_94 = arith.constant 8 : i32
    %318 = arith.muli %c5_i32_93, %c8_i32_94 : i32
    %319 = tpu.assume_multiple %318, 8 : i32
    %320 = arith.index_cast %319 : i32 to index
    %c0_95 = arith.constant 0 : index
    %321 = vector.load %arg11[%320, %c0_95] : memref<64x128xf32, #tpu.memory_space<vmem>>, vector<8x128xf32>
    %cst_96 = arith.constant dense<0.000000e+00> : vector<8x128xf32>
    %322 = tpu.matmul %315, %201, %cst_96 {dimension_numbers = #tpu.dot_dimension_numbers<[1], [0], [0], [1], [0, 0, 1, 1], [], []>} : vector<8x32xf32>, vector<32x128xf32>, vector<8x128xf32> -> vector<8x128xf32>
    %323 = arith.addf %321, %322 : vector<8x128xf32>
    %324 = arith.negf %323 : vector<8x128xf32>
    %325 = math.exp %324 : vector<8x128xf32>
    %cst_97 = arith.constant 1.000000e+00 : f32
    %326 = vector.broadcast %cst_97 : f32 to vector<8x128xf32>
    %327 = arith.addf %326, %325 : vector<8x128xf32>
    %328 = arith.divf %326, %327 : vector<8x128xf32>
    %329 = math.tanh %323 : vector<8x128xf32>
    %330 = vector.extract_strided_slice %328 {offsets = [0, 0], sizes = [8, 32], strides = [1, 1]} : vector<8x128xf32> to vector<8x32xf32>
    %331 = vector.extract_strided_slice %328 {offsets = [0, 32], sizes = [8, 32], strides = [1, 1]} : vector<8x128xf32> to vector<8x32xf32>
    %332 = vector.extract_strided_slice %329 {offsets = [0, 64], sizes = [8, 32], strides = [1, 1]} : vector<8x128xf32> to vector<8x32xf32>
    %333 = vector.extract_strided_slice %328 {offsets = [0, 96], sizes = [8, 32], strides = [1, 1]} : vector<8x128xf32> to vector<8x32xf32>
    %334 = arith.mulf %331, %313 : vector<8x32xf32>
    %335 = arith.mulf %330, %332 : vector<8x32xf32>
    %336 = arith.addf %334, %335 : vector<8x32xf32>
    %337 = math.tanh %336 : vector<8x32xf32>
    %338 = arith.mulf %333, %337 : vector<8x32xf32>
    %339 = arith.index_cast %319 : i32 to index
    %c0_98 = arith.constant 0 : index
    %340 = vector.load %arg12[%339, %c0_98] : memref<64x32xf32, #tpu.memory_space<vmem>>, vector<8x32xf32>
    tpu.vector_store %arg12[%339, %c0_98], %338 {strides = array<i32>} : memref<64x32xf32, #tpu.memory_space<vmem>>, vector<8x32xf32>,
    %c6_i32_99 = arith.constant 6 : i32
    %c8_i32_100 = arith.constant 8 : i32
    %341 = arith.muli %c6_i32_99, %c8_i32_100 : i32
    %342 = tpu.assume_multiple %341, 8 : i32
    %343 = arith.index_cast %342 : i32 to index
    %c0_101 = arith.constant 0 : index
    %344 = vector.load %arg11[%343, %c0_101] : memref<64x128xf32, #tpu.memory_space<vmem>>, vector<8x128xf32>
    %cst_102 = arith.constant dense<0.000000e+00> : vector<8x128xf32>
    %345 = tpu.matmul %338, %201, %cst_102 {dimension_numbers = #tpu.dot_dimension_numbers<[1], [0], [0], [1], [0, 0, 1, 1], [], []>} : vector<8x32xf32>, vector<32x128xf32>, vector<8x128xf32> -> vector<8x128xf32>
    %346 = arith.addf %344, %345 : vector<8x128xf32>
    %347 = arith.negf %346 : vector<8x128xf32>
    %348 = math.exp %347 : vector<8x128xf32>
    %cst_103 = arith.constant 1.000000e+00 : f32
    %349 = vector.broadcast %cst_103 : f32 to vector<8x128xf32>
    %350 = arith.addf %349, %348 : vector<8x128xf32>
    %351 = arith.divf %349, %350 : vector<8x128xf32>
    %352 = math.tanh %346 : vector<8x128xf32>
    %353 = vector.extract_strided_slice %351 {offsets = [0, 0], sizes = [8, 32], strides = [1, 1]} : vector<8x128xf32> to vector<8x32xf32>
    %354 = vector.extract_strided_slice %351 {offsets = [0, 32], sizes = [8, 32], strides = [1, 1]} : vector<8x128xf32> to vector<8x32xf32>
    %355 = vector.extract_strided_slice %352 {offsets = [0, 64], sizes = [8, 32], strides = [1, 1]} : vector<8x128xf32> to vector<8x32xf32>
    %356 = vector.extract_strided_slice %351 {offsets = [0, 96], sizes = [8, 32], strides = [1, 1]} : vector<8x128xf32> to vector<8x32xf32>
    %357 = arith.mulf %354, %336 : vector<8x32xf32>
    %358 = arith.mulf %353, %355 : vector<8x32xf32>
    %359 = arith.addf %357, %358 : vector<8x32xf32>
    %360 = math.tanh %359 : vector<8x32xf32>
    %361 = arith.mulf %356, %360 : vector<8x32xf32>
    %362 = arith.index_cast %342 : i32 to index
    %c0_104 = arith.constant 0 : index
    %363 = vector.load %arg12[%362, %c0_104] : memref<64x32xf32, #tpu.memory_space<vmem>>, vector<8x32xf32>
    tpu.vector_store %arg12[%362, %c0_104], %361 {strides = array<i32>} : memref<64x32xf32, #tpu.memory_space<vmem>>, vector<8x32xf32>,
    %c7_i32_105 = arith.constant 7 : i32
    %c8_i32_106 = arith.constant 8 : i32
    %364 = arith.muli %c7_i32_105, %c8_i32_106 : i32
    %365 = tpu.assume_multiple %364, 8 : i32
    %366 = arith.index_cast %365 : i32 to index
    %c0_107 = arith.constant 0 : index
    %367 = vector.load %arg11[%366, %c0_107] : memref<64x128xf32, #tpu.memory_space<vmem>>, vector<8x128xf32>
    %cst_108 = arith.constant dense<0.000000e+00> : vector<8x128xf32>
    %368 = tpu.matmul %361, %201, %cst_108 {dimension_numbers = #tpu.dot_dimension_numbers<[1], [0], [0], [1], [0, 0, 1, 1], [], []>} : vector<8x32xf32>, vector<32x128xf32>, vector<8x128xf32> -> vector<8x128xf32>
    %369 = arith.addf %367, %368 : vector<8x128xf32>
    %370 = arith.negf %369 : vector<8x128xf32>
    %371 = math.exp %370 : vector<8x128xf32>
    %cst_109 = arith.constant 1.000000e+00 : f32
    %372 = vector.broadcast %cst_109 : f32 to vector<8x128xf32>
    %373 = arith.addf %372, %371 : vector<8x128xf32>
    %374 = arith.divf %372, %373 : vector<8x128xf32>
    %375 = math.tanh %369 : vector<8x128xf32>
    %376 = vector.extract_strided_slice %374 {offsets = [0, 0], sizes = [8, 32], strides = [1, 1]} : vector<8x128xf32> to vector<8x32xf32>
    %377 = vector.extract_strided_slice %374 {offsets = [0, 32], sizes = [8, 32], strides = [1, 1]} : vector<8x128xf32> to vector<8x32xf32>
    %378 = vector.extract_strided_slice %375 {offsets = [0, 64], sizes = [8, 32], strides = [1, 1]} : vector<8x128xf32> to vector<8x32xf32>
    %379 = vector.extract_strided_slice %374 {offsets = [0, 96], sizes = [8, 32], strides = [1, 1]} : vector<8x128xf32> to vector<8x32xf32>
    %380 = arith.mulf %377, %359 : vector<8x32xf32>
    %381 = arith.mulf %376, %378 : vector<8x32xf32>
    %382 = arith.addf %380, %381 : vector<8x32xf32>
    %383 = math.tanh %382 : vector<8x32xf32>
    %384 = arith.mulf %379, %383 : vector<8x32xf32>
    %385 = arith.index_cast %365 : i32 to index
    %c0_110 = arith.constant 0 : index
    %386 = vector.load %arg12[%385, %c0_110] : memref<64x32xf32, #tpu.memory_space<vmem>>, vector<8x32xf32>
    tpu.vector_store %arg12[%385, %c0_110], %384 {strides = array<i32>} : memref<64x32xf32, #tpu.memory_space<vmem>>, vector<8x32xf32>,
    %c8_i32_111 = arith.constant 8 : i32
    %c0_112 = arith.constant 0 : index
    %c0_113 = arith.constant 0 : index
    %387 = vector.load %arg12[%c0_112, %c0_113] : memref<64x32xf32, #tpu.memory_space<vmem>>, vector<64x32xf32>
    %c0_114 = arith.constant 0 : index
    %c0_115 = arith.constant 0 : index
    %388 = vector.load %arg8[%c0_114, %c0_115] : memref<1x32xf32, #tpu.memory_space<vmem>>, vector<1x32xf32>
    %389 = vector.broadcast %388 : vector<1x32xf32> to vector<64x32xf32>
    %390 = arith.mulf %387, %389 : vector<64x32xf32>
    %cst_116 = arith.constant dense<0.000000e+00> : vector<64xf32>
    %391 = vector.multi_reduction <add>, %390, %cst_116 [1] : vector<64x32xf32> to vector<64xf32>
    %392 = vector.shape_cast %391 : vector<64xf32> to vector<64x1xf32>
    %c0_117 = arith.constant 0 : index
    %393 = memref.load %arg9[%c0_117] : memref<1xf32, #tpu.memory_space<smem>>
    %394 = vector.broadcast %393 : f32 to vector<64x1xf32>
    %395 = arith.addf %392, %394 : vector<64x1xf32>
    %c0_118 = arith.constant 0 : index
    %c0_119 = arith.constant 0 : index
    %c0_120 = arith.constant 0 : index
    %396 = vector.load %arg10[%c0_118, %c0_119, %c0_120] : memref<1x64x1xf32, #tpu.memory_space<vmem>>, vector<1x64x1xf32>
    %397 = vector.shape_cast %396 : vector<1x64x1xf32> to vector<64x1xf32>
    %398 = vector.shape_cast %395 : vector<64x1xf32> to vector<1x64x1xf32>
    tpu.vector_store %arg10[%c0_118, %c0_119, %c0_120], %398 {strides = array<i32>} : memref<1x64x1xf32, #tpu.memory_space<vmem>>, vector<1x64x1xf32>,
    return
  }
  func.func @transform_0(%arg0: i32) -> (i32, i32, i32) {
    %c0_i32 = arith.constant 0 : i32
    %c0_i32_0 = arith.constant 0 : i32
    %c0_i32_1 = arith.constant 0 : i32
    return %arg0, %c0_i32, %c0_i32_0 : i32, i32, i32
  }
  func.func @transform_1(%arg0: i32) -> (i32, i32) {
    %c0_i32 = arith.constant 0 : i32
    %c0_i32_0 = arith.constant 0 : i32
    %c0_i32_1 = arith.constant 0 : i32
    return %c0_i32, %c0_i32_0 : i32, i32
  }
  func.func @transform_2(%arg0: i32) -> (i32, i32) {
    %c0_i32 = arith.constant 0 : i32
    %c0_i32_0 = arith.constant 0 : i32
    %c0_i32_1 = arith.constant 0 : i32
    return %c0_i32, %c0_i32_0 : i32, i32
  }
  func.func @transform_3(%arg0: i32) -> (i32, i32) {
    %c0_i32 = arith.constant 0 : i32
    %c0_i32_0 = arith.constant 0 : i32
    %c0_i32_1 = arith.constant 0 : i32
    return %c0_i32, %c0_i32_0 : i32, i32
  }
  func.func @transform_4(%arg0: i32) -> (i32, i32) {
    %c0_i32 = arith.constant 0 : i32
    %c0_i32_0 = arith.constant 0 : i32
    %c0_i32_1 = arith.constant 0 : i32
    return %c0_i32, %c0_i32_0 : i32, i32
  }
  func.func @transform_5(%arg0: i32) -> (i32, i32) {
    %c0_i32 = arith.constant 0 : i32
    %c0_i32_0 = arith.constant 0 : i32
    %c0_i32_1 = arith.constant 0 : i32
    return %c0_i32, %c0_i32_0 : i32, i32
  }
  func.func @transform_6(%arg0: i32) -> (i32, i32) {
    %c0_i32 = arith.constant 0 : i32
    %c0_i32_0 = arith.constant 0 : i32
    %c0_i32_1 = arith.constant 0 : i32
    return %c0_i32, %c0_i32_0 : i32, i32
  }
  func.func @transform_7(%arg0: i32) -> (i32, i32) {
    %c0_i32 = arith.constant 0 : i32
    %c0_i32_0 = arith.constant 0 : i32
    %c0_i32_1 = arith.constant 0 : i32
    return %c0_i32, %c0_i32_0 : i32, i32
  }
  func.func @transform_8(%arg0: i32) -> i32 {
    %c0_i32 = arith.constant 0 : i32
    %c0_i32_0 = arith.constant 0 : i32
    return %c0_i32 : i32
  }
  func.func @transform_9(%arg0: i32) -> (i32, i32, i32) {
    %c0_i32 = arith.constant 0 : i32
    %c0_i32_0 = arith.constant 0 : i32
    %c0_i32_1 = arith.constant 0 : i32
    return %arg0, %c0_i32, %c0_i32_0 : i32, i32, i32
  }
}

</mosaic_0001>

<bundles_post_ra>
// kernel: seq2seq_b_forward.1
= control target key start
LH: loop header
LB: loop body
LE: loop exit
PB: predicated region body
PF: predicated region fallthrough
CT: control target
= control target key end

     0   :  { %vm74_vm0 = vcmask 1043456   ;;  %vm49_vm1 = vcmask 31744   ;;  %v2580_v0 = vmov 0.0   ;;  %vm2581_vm2 = vmmov 0   ;;  %s2582_s23 = smov 64   ;;  %s3088_s1 = inlined_call_operand.vmem [shape: f32[4,128], index: 1, kind: input, shape index: {}]   ;;  %s3089_s2 = inlined_call_operand.vmem [shape: f32[32,128], index: 2, kind: input, shape index: {}]   ;;  %s3090_s0 = inlined_call_operand.vmem [shape: f32[1,64,4], index: 0, kind: input, shape index: {}]   ;;  %s3091_s3 = inlined_call_operand.vmem [shape: f32[1,128], index: 3, kind: input, shape index: {}]   ;;  %s3092_s4 = inlined_call_operand.vmem [shape: f32[32,128], index: 4, kind: input, shape index: {}]   ;;  %s3093_s5 = inlined_call_operand.vmem [shape: f32[32,128], index: 5, kind: input, shape index: {}]   ;;  %s3094_s6 = inlined_call_operand.vmem [shape: f32[1,128], index: 6, kind: input, shape index: {}]   ;;  %s3095_s7 = inlined_call_operand.vmem [shape: f32[1,32], index: 7, kind: input, shape index: {}]   ;;  %s3096_s8 = inlined_call_operand.<no memory space> [shape: f32[1], index: 8, kind: input, shape index: {}]   ;;  %s3097_s9 = inlined_call_operand.vmem [shape: f32[1,64,1], index: 9, kind: output, shape index: {}]  }
   0x1   :  { %2252 = vmatprep.subr.mxu1 %v2580_v0  ;;  %v41_v1 = vld [vmem:[%s3088_s1] sm:$0xf]  ;;  %v2641_v2 = vld [vmem:[%s3089_s2 + $0x18] sm:$0xff]  ;;  %2260 = vmatprep.mubr.msk.f32.mxu1 %vm2581_vm2, %v2580_v0  ;;  %v34_v4 = vld [vmem:[%s3090_s0 + $0x8] sm:$0xff]  ;;  %vm196_vm3 = vcmask 261120   ;;  %vm2074_vm4 = vcmask 7168  }
   0x2   :  { %v33_v3 = vld [vmem:[%s3090_s0] sm:$0xff]  ;;  %2238 = vmatprep.subr.msk.mxu0 %vm74_vm0, %v41_v1  ;;  %2253 = vmatpush3.msra.mxu1 %v2641_v2  ;;  %v2655_v5 = vld [vmem:[%s3089_s2 + $0x10] sm:$0xff]  ;;  %v2663_v6 = vld [vmem:[%s3089_s2 + $0x8] sm:$0xff] }
   0x3   :  { %2239 = vmatpush3.msk.msra.mxu0 %vm74_vm0, %v41_v1  ;;  %2240 = vmatprep.mubr.msk.f32.mxu0 %vm49_vm1, %v33_v3  ;;  %v2671_v7 = vld [vmem:[%s3089_s2] sm:$0xff]  ;;  %v35_v43 = vld [vmem:[%s3090_s0 + $0x10] sm:$0xff]  ;;  %v36_v44 = vld [vmem:[%s3090_s0 + $0x18] sm:$0xff] }
   0x4   :  { %2254 = vmatprep.subr.mxu1 %v2580_v0  ;;  %2241 = vmatmul.mubr.msk.f32.vlgmr.msra.gmra.mxu0 %vm49_vm1, %v34_v4  ;;  %v2699_v9 = vld [vmem:[%s3091_s3] ss:$0 sm:$0xff]  ;;  %s2583_s3 = smov 32   ;;  %v38_v46 = vld [vmem:[%s3090_s0 + $0x28] sm:$0xff]  ;;  %v39_v47 = vld [vmem:[%s3090_s0 + $0x30] sm:$0xff] }
   0x5   :  { %2255 = vmatpush3.msra.mxu1 %v2655_v5  ;;  %2274 = vmatprep.subr.mxu0 %v2580_v0  ;;  %v37_v45 = vld [vmem:[%s3090_s0 + $0x20] sm:$0xff]  ;;  %v40_v48 = vld [vmem:[%s3090_s0 + $0x38] sm:$0xff] }
   0x6   :  { %2256 = vmatprep.subr.mxu1 %v2580_v0  ;;  %2275 = vmatpush3.msra.mxu0 %v2641_v2 }
   0x7   :  { %2257 = vmatpush3.msra.mxu1 %v2663_v6  ;;  %2276 = vmatprep.subr.mxu0 %v2580_v0 }
   0x8   :  { %2258 = vmatprep.subr.mxu1 %v2580_v0  ;;  %2277 = vmatpush3.msra.mxu0 %v2655_v5 }
   0x9   :  { %2259 = vmatpush3.msra.mxu1 %v2671_v7  ;;  %2278 = vmatprep.subr.mxu0 %v2580_v0 }
   0xa   :  { %2261 = vmatmul.mubr.f32.vlgmr.msra.gmra.mxu1 %v2580_v0  ;;  %2263 = vmatprep.subr.mxu1 %v2580_v0 }
   0xb   :  { %2264 = vmatpush3.msra.mxu1 %v2641_v2  ;;  %2271 = vmatprep.mubr.msk.f32.mxu1 %vm2581_vm2, %v2580_v0 }
   0xc   :  { %2265 = vmatprep.subr.mxu1 %v2580_v0  ;;  %2279 = vmatpush3.msra.mxu0 %v2663_v6 }
   0xd   :  { %2266 = vmatpush3.msra.mxu1 %v2655_v5  ;;  %2280 = vmatprep.subr.mxu0 %v2580_v0 }
   0xe   :  { %2267 = vmatprep.subr.mxu1 %v2580_v0  ;;  %2281 = vmatpush3.msra.mxu0 %v2671_v7 }
   0xf   :  { %2268 = vmatpush3.msra.mxu1 %v2663_v6  ;;  %2296 = vmatprep.subr.mxu0 %v2580_v0 }
  0x10   :  { %2269 = vmatprep.subr.mxu1 %v2580_v0  ;;  %2243 = vmatprep.mubr.msk.f32.mxu0 %vm49_vm1, %v35_v43 }
  0x11   :  { %2270 = vmatpush3.msra.mxu1 %v2671_v7  ;;  %2244 = vmatmul.mubr.msk.f32.gmra.mxu0 %vm49_vm1, %v36_v44 }
  0x12   :  { %2285 = vmatprep.subr.mxu1 %v2580_v0  ;;  %2246 = vmatprep.mubr.msk.f32.mxu0 %vm49_vm1, %v37_v45 }
  0x15   :  { %2247 = vmatmul.mubr.msk.f32.gmra.mxu0 %vm49_vm1, %v38_v46 }
  0x16   :  { %2249 = vmatprep.mubr.msk.f32.mxu0 %vm49_vm1, %v39_v47 }
  0x19   :  { %2250 = vmatmul.mubr.msk.f32.gmra.mxu0 %vm49_vm1, %v40_v48 }
  0x1a   :  { %2282 = vmatprep.mubr.msk.f32.mxu0 %vm2581_vm2, %v2580_v0 }
  0xc4   :  { %v2242_v8 = vpop.f32.mrf.mxu0 }
  0xc5   :  { %v150_v29 = vadd.f32 %v2242_v8, %v2699_v9 }
  0xc6   :  { %v144_v10 = vpop.f32.mrf.mxu0 }
  0xc7   :  { %v145_v11 = vadd.f32 %v2699_v9, %v144_v10 }
  0xca   :  { %v266_v12 = vpop.f32.mrf.mxu1 }
  0xcb   :  { %v270_v13 = vadd.f32 %v266_v12, %v145_v11 }
  0xcc   :  { %v2262_v14 = vpop.f32.mrf.mxu1 }
  0xcd   :  { %2452 = vtanh.f32 %v270_v13  ;;  %v2097_v16 = vmul.f32 -1.442695, %v270_v13 }
  0xcf   :  { %2454 = vpow2.f32 %v2097_v16 }
  0xd1   :  { %v2245_v53 = vpop.f32.mrf.mxu0 }
  0xd3   :  { %v154_v54 = vpop.f32.mrf.mxu0 }
  0xd4   :  { %v155_v59 = vadd.f32 %v2699_v9, %v154_v54 }
  0xd5   :  { %v2761_v55 = vpop.f32.mrf.mxu0 }
  0xd7   :  { %v2763_v56 = vpop.f32.mrf.mxu0 }
  0xd9   :  { %v2765_v57 = vpop.f32.mrf.mxu0 }
  0xda   :  { %v2453_v15 = vpop.eup %2452 }
  0xdb   :  { %280 = vrot.lane.b32.xlu0 %v2453_v15, %s2582_s23  ;;  %v2767_v58 = vpop.f32.mrf.mxu0 }
  0xdc   :  { %v2455_v17 = vpop.eup %2454 }
  0xdd   :  { %v274_v18 = vadd.f32 1.0, %v2455_v17 }
  0xdf   :  { %2456 = vrcp.f32 %v274_v18 }
  0xec   :  { %v2457_v19 = vpop.eup %2456 }
  0xed   :  { %v278_v22 = vmul.f32 0.0, %v2457_v19 }
 0x14d   :  { %v281_v20 = vpop.permute.xlu0 %280 }
 0x14e   :  { %v283_v21 = vmul.f32 %v2457_v19, %v281_v20 }
 0x150   :  { %285 = vrot.lane.b32.xlu0 %v283_v21, %s2583_s3 }
 0x1c2   :  { %v286_v23 = vpop.permute.xlu0 %285 }
 0x1c3   :  { %v288_v24 = vadd.f32 %v286_v23, %v278_v22 }
 0x1c5   :  { %2458 = vtanh.f32 %v288_v24 }
 0x1d2   :  { %v2459_v25 = vpop.eup %2458 }
 0x1d3   :  { %291 = vrot.lane.b32.xlu1 %v2459_v25, %s2582_s23 }
 0x245   :  { %v292_v26 = vpop.permute.xlu1 %291 }
 0x246   :  { %v294_v27 = vmul.f32 %v2457_v19, %v292_v26  ;;  %v160_v19 = vadd.f32 %v2245_v53, %v2699_v9 }
 0x248   :  { %296 = vrot.lane.b32.xlu1 %v294_v27, %s2583_s3 }
 0x2ba   :  { %v297_v28 = vpop.permute.xlu1 %296 }
 0x2bb   :  { %299 = vst.msk [vmem:[#allocation3] sm:$0xff] %vm196_vm3, %v297_v28  ;;  %2272 = vmatmul.mubr.msk.f32.vlgmr.msra.gmra.mxu1 %vm196_vm3, %v297_v28 }
 0x2bc   :  { %2286 = vmatpush3.msra.mxu1 %v2641_v2  ;;  %2293 = vmatprep.mubr.msk.f32.mxu1 %vm2581_vm2, %v2580_v0 }
 0x2bd   :  { %2287 = vmatprep.subr.mxu1 %v2580_v0 }
 0x2be   :  { %2288 = vmatpush3.msra.mxu1 %v2655_v5 }
 0x2bf   :  { %2289 = vmatprep.subr.mxu1 %v2580_v0 }
 0x2c0   :  { %2290 = vmatpush3.msra.mxu1 %v2663_v6 }
 0x2c1   :  { %2291 = vmatprep.subr.mxu1 %v2580_v0 }
 0x2c2   :  { %2292 = vmatpush3.msra.mxu1 %v2671_v7 }
 0x2c3   :  { %2307 = vmatprep.subr.mxu1 %v2580_v0 }
 0x37b   :  { %v370_v30 = vpop.f32.mrf.mxu1 }
 0x37c   :  { %v374_v31 = vadd.f32 %v370_v30, %v150_v29 }
 0x37d   :  { %v2273_v32 = vpop.f32.mrf.mxu1 }
 0x37e   :  { %2460 = vtanh.f32 %v374_v31  ;;  %v2099_v34 = vmul.f32 -1.442695, %v374_v31 }
 0x380   :  { %2462 = vpow2.f32 %v2099_v34 }
 0x38b   :  { %v2461_v33 = vpop.eup %2460 }
 0x38c   :  { %384 = vrot.lane.b32.xlu0 %v2461_v33, %s2582_s23 }
 0x38d   :  { %v2463_v35 = vpop.eup %2462 }
 0x38e   :  { %v378_v36 = vadd.f32 1.0, %v2463_v35 }
 0x390   :  { %2464 = vrcp.f32 %v378_v36 }
 0x39d   :  { %v2465_v37 = vpop.eup %2464 }
 0x39e   :  { %v382_v40 = vmul.f32 %v2465_v37, %v288_v24 }
 0x3fe   :  { %v385_v38 = vpop.permute.xlu0 %384 }
 0x3ff   :  { %v387_v39 = vmul.f32 %v2465_v37, %v385_v38 }
 0x401   :  { %389 = vrot.lane.b32.xlu1 %v387_v39, %s2583_s3 }
 0x473   :  { %v390_v41 = vpop.permute.xlu1 %389 }
 0x474   :  { %v392_v42 = vadd.f32 %v390_v41, %v382_v40 }
 0x476   :  { %2466 = vtanh.f32 %v392_v42 }
 0x483   :  { %v2467_v49 = vpop.eup %2466 }
 0x484   :  { %395 = vrot.lane.b32.xlu0 %v2467_v49, %s2582_s23 }
 0x4f6   :  { %v396_v50 = vpop.permute.xlu0 %395 }
 0x4f7   :  { %v398_v51 = vmul.f32 %v2465_v37, %v396_v50  ;;  %v165_v37 = vadd.f32 %v2699_v9, %v2763_v56 }
 0x4f9   :  { %400 = vrot.lane.b32.xlu1 %v398_v51, %s2583_s3 }
 0x56b   :  { %v401_v52 = vpop.permute.xlu1 %400 }
 0x56c   :  { %404 = vst.msk [vmem:[#allocation3 + $0x8] sm:$0xff] %vm196_vm3, %v401_v52  ;;  %2283 = vmatmul.mubr.msk.f32.vlgmr.msra.gmra.mxu0 %vm196_vm3, %v401_v52 }
 0x56d   :  { %2297 = vmatpush3.msra.mxu0 %v2641_v2  ;;  %2304 = vmatprep.mubr.msk.f32.mxu0 %vm2581_vm2, %v2580_v0 }
 0x56e   :  { %2298 = vmatprep.subr.mxu0 %v2580_v0 }
 0x56f   :  { %2299 = vmatpush3.msra.mxu0 %v2655_v5 }
 0x570   :  { %2300 = vmatprep.subr.mxu0 %v2580_v0 }
 0x571   :  { %2301 = vmatpush3.msra.mxu0 %v2663_v6 }
 0x572   :  { %2302 = vmatprep.subr.mxu0 %v2580_v0 }
 0x573   :  { %2303 = vmatpush3.msra.mxu0 %v2671_v7 }
 0x574   :  { %2318 = vmatprep.subr.mxu0 %v2580_v0 }
 0x62c   :  { %v475_v60 = vpop.f32.mrf.mxu0 }
 0x62d   :  { %v479_v61 = vadd.f32 %v475_v60, %v155_v59 }
 0x62e   :  { %v2284_v62 = vpop.f32.mrf.mxu0 }
 0x62f   :  { %2468 = vtanh.f32 %v479_v61  ;;  %v2101_v1 = vmul.f32 -1.442695, %v479_v61 }
 0x631   :  { %2470 = vpow2.f32 %v2101_v1 }
 0x63c   :  { %v2469_v63 = vpop.eup %2468 }
 0x63d   :  { %489 = vrot.lane.b32.xlu0 %v2469_v63, %s2582_s23 }
 0x63e   :  { %v2471_v3 = vpop.eup %2470 }
 0x63f   :  { %v483_v4 = vadd.f32 1.0, %v2471_v3 }
 0x641   :  { %2472 = vrcp.f32 %v483_v4 }
 0x64e   :  { %v2473_v8 = vpop.eup %2472 }
 0x64f   :  { %v487_v12 = vmul.f32 %v2473_v8, %v392_v42 }
 0x6af   :  { %v490_v10 = vpop.permute.xlu0 %489 }
 0x6b0   :  { %v492_v11 = vmul.f32 %v2473_v8, %v490_v10 }
 0x6b2   :  { %494 = vrot.lane.b32.xlu1 %v492_v11, %s2583_s3 }
 0x724   :  { %v495_v13 = vpop.permute.xlu1 %494 }
 0x725   :  { %v497_v14 = vadd.f32 %v495_v13, %v487_v12 }
 0x727   :  { %2474 = vtanh.f32 %v497_v14 }
 0x734   :  { %v2475_v15 = vpop.eup %2474 }
 0x735   :  { %500 = vrot.lane.b32.xlu0 %v2475_v15, %s2582_s23  ;;  %v1035_v15 = vld [vmem:[#allocation3] sm:$0xff] }
 0x7a7   :  { %v501_v16 = vpop.permute.xlu0 %500 }
 0x7a8   :  { %v503_v17 = vmul.f32 %v2473_v8, %v501_v16  ;;  %v1046_v8 = vld [vmem:[%s3092_s4 + $0x18] sm:$0xff]  ;;  %v1044_v16 = vld [vmem:[%s3092_s4 + $0x8] sm:$0xff] }
 0x7aa   :  { %505 = vrot.lane.b32.xlu1 %v503_v17, %s2583_s3  ;;  %v1043_v17 = vld [vmem:[%s3092_s4] sm:$0xff] }
 0x81c   :  { %v506_v18 = vpop.permute.xlu1 %505 }
 0x81d   :  { %509 = vst.msk [vmem:[#allocation3 + $0x10] sm:$0xff] %vm196_vm3, %v506_v18  ;;  %2294 = vmatmul.mubr.msk.f32.vlgmr.msra.gmra.mxu1 %vm196_vm3, %v506_v18  ;;  %v1036_v18 = vld [vmem:[#allocation3 + $0x8] sm:$0xff] }
 0x81e   :  { %2308 = vmatpush3.msra.mxu1 %v2641_v2  ;;  %2315 = vmatprep.mubr.msk.f32.mxu1 %vm2581_vm2, %v2580_v0 }
 0x81f   :  { %2309 = vmatprep.subr.mxu1 %v2580_v0 }
 0x820   :  { %2310 = vmatpush3.msra.mxu1 %v2655_v5 }
 0x821   :  { %2311 = vmatprep.subr.mxu1 %v2580_v0 }
 0x822   :  { %2312 = vmatpush3.msra.mxu1 %v2663_v6 }
 0x823   :  { %2313 = vmatprep.subr.mxu1 %v2580_v0 }
 0x824   :  { %2314 = vmatpush3.msra.mxu1 %v2671_v7 }
 0x825   :  { %2329 = vmatprep.subr.mxu1 %v2580_v0 }
 0x8dd   :  { %v580_v20 = vpop.f32.mrf.mxu1 }
 0x8de   :  { %v584_v21 = vadd.f32 %v580_v20, %v160_v19  ;;  %v1037_v19 = vld [vmem:[#allocation3 + $0x10] sm:$0xff] }
 0x8df   :  { %v2295_v22 = vpop.f32.mrf.mxu1 }
 0x8e0   :  { %2476 = vtanh.f32 %v584_v21  ;;  %v2103_v24 = vmul.f32 -1.442695, %v584_v21 }
 0x8e2   :  { %2478 = vpow2.f32 %v2103_v24 }
 0x8ed   :  { %v2477_v23 = vpop.eup %2476 }
 0x8ee   :  { %594 = vrot.lane.b32.xlu0 %v2477_v23, %s2582_s23  ;;  %v175_v23 = vadd.f32 %v2699_v9, %v2767_v58 }
 0x8ef   :  { %v2479_v25 = vpop.eup %2478 }
 0x8f0   :  { %v588_v26 = vadd.f32 1.0, %v2479_v25 }
 0x8f2   :  { %2480 = vrcp.f32 %v588_v26 }
 0x8ff   :  { %v2481_v27 = vpop.eup %2480 }
 0x900   :  { %v592_v30 = vmul.f32 %v2481_v27, %v497_v14  ;;  %v1045_v14 = vld [vmem:[%s3092_s4 + $0x10] sm:$0xff] }
 0x960   :  { %v595_v28 = vpop.permute.xlu0 %594 }
 0x961   :  { %v597_v29 = vmul.f32 %v2481_v27, %v595_v28 }
 0x963   :  { %599 = vrot.lane.b32.xlu1 %v597_v29, %s2583_s3 }
 0x9d5   :  { %v600_v31 = vpop.permute.xlu1 %599 }
 0x9d6   :  { %v602_v32 = vadd.f32 %v600_v31, %v592_v30 }
 0x9d8   :  { %2482 = vtanh.f32 %v602_v32 }
 0x9e5   :  { %v2483_v33 = vpop.eup %2482 }
 0x9e6   :  { %605 = vrot.lane.b32.xlu0 %v2483_v33, %s2582_s23 }
 0xa58   :  { %v606_v34 = vpop.permute.xlu0 %605 }
 0xa59   :  { %v608_v35 = vmul.f32 %v2481_v27, %v606_v34 }
 0xa5b   :  { %610 = vrot.lane.b32.xlu1 %v608_v35, %s2583_s3 }
 0xacd   :  { %v611_v36 = vpop.permute.xlu1 %610 }
 0xace   :  { %614 = vst.msk [vmem:[#allocation3 + $0x18] sm:$0xff] %vm196_vm3, %v611_v36  ;;  %2305 = vmatmul.mubr.msk.f32.vlgmr.msra.gmra.mxu0 %vm196_vm3, %v611_v36 }
 0xacf   :  { %2319 = vmatpush3.msra.mxu0 %v2641_v2  ;;  %2326 = vmatprep.mubr.msk.f32.mxu0 %vm2581_vm2, %v2580_v0 }
 0xad0   :  { %2320 = vmatprep.subr.mxu0 %v2580_v0 }
 0xad1   :  { %2321 = vmatpush3.msra.mxu0 %v2655_v5 }
 0xad2   :  { %2322 = vmatprep.subr.mxu0 %v2580_v0 }
 0xad3   :  { %2323 = vmatpush3.msra.mxu0 %v2663_v6 }
 0xad4   :  { %2324 = vmatprep.subr.mxu0 %v2580_v0 }
 0xad5   :  { %2325 = vmatpush3.msra.mxu0 %v2671_v7  ;;  %v1038_v20 = vld [vmem:[#allocation3 + $0x18] sm:$0xff] }
 0xad6   :  { %2340 = vmatprep.subr.mxu0 %v1046_v8 }
 0xb8e   :  { %v685_v38 = vpop.f32.mrf.mxu0 }
 0xb8f   :  { %v689_v39 = vadd.f32 %v685_v38, %v165_v37  ;;  %v2858_v37 = vld [vmem:[%s3093_s5 + $0x18] sm:$0xff]  ;;  %v2864_v38 = vld [vmem:[%s3093_s5 + $0x10] sm:$0xff] }
 0xb90   :  { %v2306_v40 = vpop.f32.mrf.mxu0 }
 0xb91   :  { %2484 = vtanh.f32 %v689_v39  ;;  %v2105_v42 = vmul.f32 -1.442695, %v689_v39  ;;  %v2871_v39 = vld [vmem:[%s3093_s5 + $0x8] sm:$0xff]  ;;  %v2878_v40 = vld [vmem:[%s3093_s5] sm:$0xff] }
 0xb93   :  { %2486 = vpow2.f32 %v2105_v42 }
 0xb9e   :  { %v2485_v41 = vpop.eup %2484 }
 0xb9f   :  { %699 = vrot.lane.b32.xlu0 %v2485_v41, %s2582_s23 }
 0xba0   :  { %v2487_v43 = vpop.eup %2486 }
 0xba1   :  { %v693_v44 = vadd.f32 1.0, %v2487_v43 }
 0xba3   :  { %2488 = vrcp.f32 %v693_v44 }
 0xbb0   :  { %v2489_v45 = vpop.eup %2488 }
 0xbb1   :  { %v697_v48 = vmul.f32 %v2489_v45, %v602_v32 }
 0xc11   :  { %v700_v46 = vpop.permute.xlu0 %699 }
 0xc12   :  { %v702_v47 = vmul.f32 %v2489_v45, %v700_v46 }
 0xc14   :  { %704 = vrot.lane.b32.xlu1 %v702_v47, %s2583_s3 }
 0xc86   :  { %v705_v49 = vpop.permute.xlu1 %704 }
 0xc87   :  { %v707_v50 = vadd.f32 %v705_v49, %v697_v48 }
 0xc89   :  { %2490 = vtanh.f32 %v707_v50 }
 0xc96   :  { %v2491_v51 = vpop.eup %2490 }
 0xc97   :  { %710 = vrot.lane.b32.xlu0 %v2491_v51, %s2582_s23  ;;  %v2915_v51 = vld [vmem:[%s3094_s6] ss:$0 sm:$0xff] }
 0xd09   :  { %v711_v52 = vpop.permute.xlu0 %710 }
 0xd0a   :  { %v713_v53 = vmul.f32 %v2489_v45, %v711_v52  ;;  %v180_v45 = vadd.f32 %v2765_v57, %v2699_v9 }
 0xd0c   :  { %715 = vrot.lane.b32.xlu1 %v713_v53, %s2583_s3 }
 0xd7e   :  { %v716_v54 = vpop.permute.xlu1 %715 }
 0xd7f   :  { %719 = vst.msk [vmem:[#allocation3 + $0x20] sm:$0xff] %vm196_vm3, %v716_v54  ;;  %2316 = vmatmul.mubr.msk.f32.vlgmr.msra.gmra.mxu1 %vm196_vm3, %v716_v54 }
 0xd80   :  { %2330 = vmatpush3.msra.mxu1 %v2641_v2  ;;  %2337 = vmatprep.mubr.msk.f32.mxu1 %vm2581_vm2, %v2580_v0  ;;  %v170_v2 = vadd.f32 %v2761_v55, %v2699_v9 }
 0xd81   :  { %2331 = vmatprep.subr.mxu1 %v2580_v0 }
 0xd82   :  { %2332 = vmatpush3.msra.mxu1 %v2655_v5 }
 0xd83   :  { %2333 = vmatprep.subr.mxu1 %v2580_v0 }
 0xd84   :  { %2334 = vmatpush3.msra.mxu1 %v2663_v6 }
 0xd85   :  { %2335 = vmatprep.subr.mxu1 %v2580_v0 }
 0xd86   :  { %2336 = vmatpush3.msra.mxu1 %v2671_v7  ;;  %v1039_v21 = vld [vmem:[#allocation3 + $0x20] sm:$0xff] }
 0xd87   :  { %2360 = vmatprep.subr.mxu1 %v2580_v0 }
 0xe3f   :  { %v790_v56 = vpop.f32.mrf.mxu1 }
 0xe40   :  { %v794_v59 = vadd.f32 %v790_v56, %v170_v2 }
 0xe41   :  { %v2317_v60 = vpop.f32.mrf.mxu1 }
 0xe42   :  { %2492 = vtanh.f32 %v794_v59  ;;  %v2107_v5 = vmul.f32 -1.442695, %v794_v59 }
 0xe44   :  { %2494 = vpow2.f32 %v2107_v5 }
 0xe4f   :  { %v2493_v61 = vpop.eup %2492 }
 0xe50   :  { %804 = vrot.lane.b32.xlu0 %v2493_v61, %s2582_s23 }
 0xe51   :  { %v2495_v62 = vpop.eup %2494 }
 0xe52   :  { %v798_v6 = vadd.f32 1.0, %v2495_v62 }
 0xe54   :  { %2496 = vrcp.f32 %v798_v6 }
 0xe61   :  { %v2497_v63 = vpop.eup %2496 }
 0xe62   :  { %v802_v3 = vmul.f32 %v2497_v63, %v707_v50 }
 0xec2   :  { %v805_v1 = vpop.permute.xlu0 %804 }
 0xec3   :  { %v807_v7 = vmul.f32 %v2497_v63, %v805_v1 }
 0xec5   :  { %809 = vrot.lane.b32.xlu1 %v807_v7, %s2583_s3 }
 0xf37   :  { %v810_v4 = vpop.permute.xlu1 %809 }
 0xf38   :  { %v812_v55 = vadd.f32 %v810_v4, %v802_v3 }
 0xf3a   :  { %2498 = vtanh.f32 %v812_v55 }
 0xf47   :  { %v2499_v10 = vpop.eup %2498 }
 0xf48   :  { %815 = vrot.lane.b32.xlu0 %v2499_v10, %s2582_s23 }
 0xfba   :  { %v816_v11 = vpop.permute.xlu0 %815 }
 0xfbb   :  { %v818_v12 = vmul.f32 %v2497_v63, %v816_v11 }
 0xfbd   :  { %820 = vrot.lane.b32.xlu1 %v818_v12, %s2583_s3 }
0x102f   :  { %v821_v13 = vpop.permute.xlu1 %820 }
0x1030   :  { %824 = vst.msk [vmem:[#allocation3 + $0x28] sm:$0xff] %vm196_vm3, %v821_v13  ;;  %2327 = vmatmul.mubr.msk.f32.vlgmr.msra.gmra.mxu0 %vm196_vm3, %v821_v13 }
0x1031   :  { %2341 = vmatpush3.msra.mxu0 %v1046_v8  ;;  %2348 = vmatprep.mubr.msk.f32.mxu0 %vm196_vm3, %v1035_v15 }
0x1032   :  { %2342 = vmatprep.subr.mxu0 %v1045_v14 }
0x1033   :  { %2343 = vmatpush3.msra.mxu0 %v1045_v14 }
0x1034   :  { %2344 = vmatprep.subr.mxu0 %v1044_v16 }
0x1035   :  { %2345 = vmatpush3.msra.mxu0 %v1044_v16 }
0x1036   :  { %2346 = vmatprep.subr.mxu0 %v1043_v17 }
0x1037   :  { %2347 = vmatpush3.msra.mxu0 %v1043_v17  ;;  %v1040_v22 = vld [vmem:[#allocation3 + $0x28] sm:$0xff] }
0x1038   :  { %2349 = vmatmul.mubr.msk.f32.vlgmr.msra.gmra.mxu0 %vm196_vm3, %v1036_v18  ;;  %2382 = vmatprep.subr.mxu0 %v2580_v0 }
0x1039   :  { %2351 = vmatprep.mubr.msk.f32.mxu0 %vm196_vm3, %v1037_v19  ;;  %2383 = vmatpush3.msra.mxu0 %v2858_v37 }
0x103a   :  { %2384 = vmatprep.subr.mxu0 %v2580_v0 }
0x103b   :  { %2385 = vmatpush3.msra.mxu0 %v2864_v38 }
0x103c   :  { %2352 = vmatmul.mubr.msk.f32.gmra.mxu0 %vm196_vm3, %v1038_v20  ;;  %2386 = vmatprep.subr.mxu0 %v2580_v0 }
0x103d   :  { %2354 = vmatprep.mubr.msk.f32.mxu0 %vm196_vm3, %v1039_v21  ;;  %2387 = vmatpush3.msra.mxu0 %v2871_v39 }
0x103e   :  { %2388 = vmatprep.subr.mxu0 %v2580_v0 }
0x103f   :  { %2389 = vmatpush3.msra.mxu0 %v2878_v40 }
0x1040   :  { %2355 = vmatmul.mubr.msk.f32.gmra.mxu0 %vm196_vm3, %v1040_v22  ;;  %2404 = vmatprep.subr.mxu0 %v2580_v0 }
0x10f0   :  { %v895_v24 = vpop.f32.mrf.mxu0 }
0x10f1   :  { %v899_v25 = vadd.f32 %v895_v24, %v175_v23 }
0x10f2   :  { %v2328_v26 = vpop.f32.mrf.mxu0 }
0x10f3   :  { %2500 = vtanh.f32 %v899_v25  ;;  %v2109_v28 = vmul.f32 -1.442695, %v899_v25 }
0x10f5   :  { %2502 = vpow2.f32 %v2109_v28 }
0x10f8   :  { %v2910_v46 = vpop.f32.mrf.mxu0 }
0x10f9   :  { %v1150_v21 = vadd.f32 %v2910_v46, %v2915_v51 }
0x10fa   :  { %v1144_v50 = vpop.f32.mrf.mxu0 }
0x10fb   :  { %v1145_v52 = vadd.f32 %v2915_v51, %v1144_v50 }
0x1100   :  { %v2501_v27 = vpop.eup %2500 }
0x1101   :  { %909 = vrot.lane.b32.xlu0 %v2501_v27, %s2582_s23 }
0x1102   :  { %v2503_v29 = vpop.eup %2502 }
0x1103   :  { %v903_v30 = vadd.f32 1.0, %v2503_v29 }
0x1105   :  { %2504 = vrcp.f32 %v903_v30 }
0x1112   :  { %v2505_v31 = vpop.eup %2504 }
0x1113   :  { %v907_v34 = vmul.f32 %v2505_v31, %v812_v55 }
0x1173   :  { %v910_v32 = vpop.permute.xlu0 %909 }
0x1174   :  { %v912_v33 = vmul.f32 %v2505_v31, %v910_v32 }
0x1176   :  { %914 = vrot.lane.b32.xlu1 %v912_v33, %s2583_s3 }
0x11e8   :  { %v915_v35 = vpop.permute.xlu1 %914 }
0x11e9   :  { %v2851_v58 = vadd.f32 %v915_v35, %v907_v34 }
0x11eb   :  { %2506 = vtanh.f32 %v2851_v58 }
0x11f8   :  { %v2507_v36 = vpop.eup %2506 }
0x11f9   :  { %920 = vrot.lane.b32.xlu0 %v2507_v36, %s2582_s23 }
0x126b   :  { %v921_v41 = vpop.permute.xlu0 %920 }
0x126c   :  { %v923_v42 = vmul.f32 %v2505_v31, %v921_v41 }
0x126e   :  { %925 = vrot.lane.b32.xlu1 %v923_v42, %s2583_s3 }
0x12e0   :  { %v926_v43 = vpop.permute.xlu1 %925 }
0x12e1   :  { %929 = vst.msk [vmem:[#allocation3 + $0x30] sm:$0xff] %vm196_vm3, %v926_v43  ;;  %2338 = vmatmul.mubr.msk.f32.vlgmr.msra.gmra.mxu1 %vm196_vm3, %v926_v43 }
0x12e2   :  { %2361 = vmatpush3.msra.mxu1 %v2858_v37  ;;  %2368 = vmatprep.mubr.msk.f32.mxu1 %vm2581_vm2, %v2580_v0 }
0x12e3   :  { %2362 = vmatprep.subr.mxu1 %v2580_v0 }
0x12e4   :  { %2363 = vmatpush3.msra.mxu1 %v2864_v38 }
0x12e5   :  { %2364 = vmatprep.subr.mxu1 %v2580_v0 }
0x12e6   :  { %2365 = vmatpush3.msra.mxu1 %v2871_v39 }
0x12e7   :  { %2366 = vmatprep.subr.mxu1 %v2580_v0 }
0x12e8   :  { %2367 = vmatpush3.msra.mxu1 %v2878_v40  ;;  %v1041_v44 = vld [vmem:[#allocation3 + $0x30] sm:$0xff] }
0x12e9   :  { %2369 = vmatmul.mubr.f32.vlgmr.msra.gmra.mxu1 %v2580_v0  ;;  %2357 = vmatprep.mubr.msk.f32.mxu0 %vm196_vm3, %v1041_v44  ;;  %v2353_v44 = vpop.f32.mrf.mxu0 }
0x12ea   :  { %2371 = vmatprep.subr.mxu1 %v2580_v0  ;;  %2379 = vmatprep.mubr.msk.f32.mxu1 %vm2581_vm2, %v2580_v0 }
0x12eb   :  { %2372 = vmatpush3.msra.mxu1 %v2858_v37 }
0x12ec   :  { %2373 = vmatprep.subr.mxu1 %v2580_v0 }
0x12ed   :  { %2374 = vmatpush3.msra.mxu1 %v2864_v38 }
0x12ee   :  { %2375 = vmatprep.subr.mxu1 %v2580_v0 }
0x12ef   :  { %2376 = vmatpush3.msra.mxu1 %v2871_v39 }
0x12f0   :  { %2377 = vmatprep.subr.mxu1 %v2580_v0 }
0x12f1   :  { %2378 = vmatpush3.msra.mxu1 %v2878_v40 }
0x12f2   :  { %2393 = vmatprep.subr.mxu1 %v2580_v0 }
0x13a1   :  { %v1000_v47 = vpop.f32.mrf.mxu1 }
0x13a2   :  { %v1004_v48 = vadd.f32 %v1000_v47, %v180_v45  ;;  %v1154_v45 = vpop.f32.mrf.mxu0 }
0x13a3   :  { %v2339_v49 = vpop.f32.mrf.mxu1  ;;  %v1155_v50 = vadd.f32 %v2915_v51, %v1154_v45 }
0x13a4   :  { %v2111_v3 = vmul.f32 -1.442695, %v1004_v48  ;;  %v2961_v46 = vpop.f32.mrf.mxu0 }
0x13a6   :  { %v2963_v47 = vpop.f32.mrf.mxu0 }
0x13a9   :  { %v1262_v53 = vpop.f32.mrf.mxu1 }
0x13aa   :  { %v1266_v54 = vadd.f32 %v1262_v53, %v1145_v52 }
0x13ab   :  { %v2370_v2 = vpop.f32.mrf.mxu1 }
0x13ac   :  { %2508 = vtanh.f32 %v1266_v54  ;;  %v2121_v9 = vmul.f32 -1.442695, %v1266_v54 }
0x13ae   :  { %2510 = vpow2.f32 %v2121_v9 }
0x13b9   :  { %v2509_v56 = vpop.eup %2508 }
0x13ba   :  { %1276 = vrot.lane.b32.xlu0 %v2509_v56, %s2582_s23 }
0x13bb   :  { %v2511_v57 = vpop.eup %2510 }
0x13bc   :  { %v1270_v59 = vadd.f32 1.0, %v2511_v57 }
0x13be   :  { %2512 = vrcp.f32 %v1270_v59 }
0x13cb   :  { %v2513_v60 = vpop.eup %2512 }
0x13cc   :  { %v1274_v62 = vmul.f32 0.0, %v2513_v60 }
0x142c   :  { %v1277_v61 = vpop.permute.xlu0 %1276 }
0x142d   :  { %v1279_v5 = vmul.f32 %v2513_v60, %v1277_v61 }
0x142f   :  { %1281 = vrot.lane.b32.xlu1 %v1279_v5, %s2583_s3 }
0x14a1   :  { %v1282_v6 = vpop.permute.xlu1 %1281 }
0x14a2   :  { %v1284_v63 = vadd.f32 %v1282_v6, %v1274_v62 }
0x14a4   :  { %2514 = vtanh.f32 %v1284_v63 }
0x14a5   :  { %2516 = vtanh.f32 %v1004_v48 }
0x14a6   :  { %2518 = vpow2.f32 %v2111_v3 }
0x14b1   :  { %v2515_v1 = vpop.eup %2514 }
0x14b2   :  { %1287 = vrot.lane.b32.xlu0 %v2515_v1, %s2582_s23  ;;  %v2517_v7 = vpop.eup %2516 }
0x14b3   :  { %v2519_v4 = vpop.eup %2518 }
0x14b4   :  { %v1008_v55 = vadd.f32 1.0, %v2519_v4  ;;  %v1160_v4 = vadd.f32 %v2353_v44, %v2915_v51 }
0x14b6   :  { %1014 = vrot.lane.b32.xlu0 %v2517_v7, %s2582_s23  ;;  %2520 = vrcp.f32 %v1008_v55 }
0x14c3   :  { %v2521_v11 = vpop.eup %2520 }
0x14c4   :  { %v1012_v15 = vmul.f32 %v2521_v11, %v2851_v58 }
0x1524   :  { %v1288_v8 = vpop.permute.xlu0 %1287 }
0x1525   :  { %v1290_v10 = vmul.f32 %v2513_v60, %v1288_v8 }
0x1527   :  { %1292 = vrot.lane.b32.xlu1 %v1290_v10, %s2583_s3 }
0x1528   :  { %v1015_v12 = vpop.permute.xlu0 %1014 }
0x1529   :  { %v1017_v13 = vmul.f32 %v2521_v11, %v1015_v12 }
0x152b   :  { %1019 = vrot.lane.b32.xlu0 %v1017_v13, %s2583_s3 }
0x1599   :  { %v1293_v14 = vpop.permute.xlu1 %1292 }
0x159a   :  { %1295 = vst.msk [vmem:[#allocation3] sm:$0xff] %vm196_vm3, %v1293_v14  ;;  %2380 = vmatmul.mubr.msk.f32.vlgmr.msra.gmra.mxu1 %vm196_vm3, %v1293_v14 }
0x159b   :  { %2394 = vmatpush3.msra.mxu1 %v2858_v37  ;;  %2401 = vmatprep.mubr.msk.f32.mxu1 %vm2581_vm2, %v2580_v0 }
0x159c   :  { %2395 = vmatprep.subr.mxu1 %v2580_v0 }
0x159d   :  { %v1020_v16 = vpop.permute.xlu0 %1019  ;;  %2396 = vmatpush3.msra.mxu1 %v2864_v38 }
0x159e   :  { %v1022_v17 = vadd.f32 %v1020_v16, %v1012_v15  ;;  %2397 = vmatprep.subr.mxu1 %v2580_v0 }
0x159f   :  { %2398 = vmatpush3.msra.mxu1 %v2871_v39 }
0x15a0   :  { %2522 = vtanh.f32 %v1022_v17  ;;  %2399 = vmatprep.subr.mxu1 %v2580_v0 }
0x15a1   :  { %2400 = vmatpush3.msra.mxu1 %v2878_v40 }
0x15a2   :  { %2415 = vmatprep.subr.mxu1 %v2580_v0 }
0x15ad   :  { %v2523_v18 = vpop.eup %2522 }
0x15ae   :  { %1025 = vrot.lane.b32.xlu0 %v2523_v18, %s2582_s23 }
0x1620   :  { %v1026_v19 = vpop.permute.xlu0 %1025 }
0x1621   :  { %v1028_v20 = vmul.f32 %v2521_v11, %v1026_v19 }
0x1623   :  { %1030 = vrot.lane.b32.xlu0 %v1028_v20, %s2583_s3 }
0x165a   :  { %v1365_v22 = vpop.f32.mrf.mxu1 }
0x165b   :  { %v1369_v23 = vadd.f32 %v1365_v22, %v1150_v21 }
0x165c   :  { %v2381_v24 = vpop.f32.mrf.mxu1 }
0x165d   :  { %2524 = vtanh.f32 %v1369_v23  ;;  %v2123_v28 = vmul.f32 -1.442695, %v1369_v23 }
0x165f   :  { %2526 = vpow2.f32 %v2123_v28 }
0x166a   :  { %v2525_v25 = vpop.eup %2524 }
0x166b   :  { %1379 = vrot.lane.b32.xlu1 %v2525_v25, %s2582_s23  ;;  %v1165_v25 = vadd.f32 %v2915_v51, %v2963_v47  ;;  %v1170_v47 = vadd.f32 %v2961_v46, %v2915_v51 }
0x166c   :  { %v2527_v29 = vpop.eup %2526 }
0x166d   :  { %v1373_v30 = vadd.f32 1.0, %v2527_v29 }
0x166f   :  { %2528 = vrcp.f32 %v1373_v30 }
0x167c   :  { %v2529_v31 = vpop.eup %2528 }
0x167d   :  { %v1377_v34 = vmul.f32 %v2529_v31, %v1284_v63 }
0x1695   :  { %v1031_v26 = vpop.permute.xlu0 %1030 }
0x1696   :  { %1034 = vst.msk [vmem:[#allocation3 + $0x38] sm:$0xff] %vm196_vm3, %v1031_v26 }
0x169d   :  { %v1042_v27 = vld [vmem:[#allocation3 + $0x38] sm:$0xff] }
0x169e   :  { %2358 = vmatmul.mubr.msk.f32.gmra.mxu0 %vm196_vm3, %v1042_v27 }
0x169f   :  { %2390 = vmatprep.mubr.msk.f32.mxu0 %vm2581_vm2, %v2580_v0 }
0x16dd   :  { %v1380_v32 = vpop.permute.xlu1 %1379 }
0x16de   :  { %v1382_v33 = vmul.f32 %v2529_v31, %v1380_v32 }
0x16e0   :  { %1384 = vrot.lane.b32.xlu1 %v1382_v33, %s2583_s3 }
0x1752   :  { %v1385_v35 = vpop.permute.xlu1 %1384 }
0x1753   :  { %v1387_v58 = vadd.f32 %v1385_v35, %v1377_v34 }
0x1755   :  { %2530 = vtanh.f32 %v1387_v58 }
0x175e   :  { %v2965_v48 = vpop.f32.mrf.mxu0 }
0x1760   :  { %v2967_v49 = vpop.f32.mrf.mxu0 }
0x1762   :  { %v2531_v36 = vpop.eup %2530 }
0x1763   :  { %1390 = vrot.lane.b32.xlu1 %v2531_v36, %s2582_s23 }
0x17d5   :  { %v1391_v41 = vpop.permute.xlu1 %1390 }
0x17d6   :  { %v1393_v42 = vmul.f32 %v2529_v31, %v1391_v41 }
0x17d8   :  { %1395 = vrot.lane.b32.xlu1 %v1393_v42, %s2583_s3 }
0x184a   :  { %v1396_v43 = vpop.permute.xlu1 %1395 }
0x184b   :  { %1398 = vst.msk [vmem:[#allocation3 + $0x8] sm:$0xff] %vm196_vm3, %v1396_v43  ;;  %2391 = vmatmul.mubr.msk.f32.vlgmr.msra.gmra.mxu0 %vm196_vm3, %v1396_v43 }
0x184c   :  { %2405 = vmatpush3.msra.mxu0 %v2858_v37  ;;  %2412 = vmatprep.mubr.msk.f32.mxu0 %vm2581_vm2, %v2580_v0 }
0x184d   :  { %2406 = vmatprep.subr.mxu0 %v2580_v0 }
0x184e   :  { %2407 = vmatpush3.msra.mxu0 %v2864_v38 }
0x184f   :  { %2408 = vmatprep.subr.mxu0 %v2580_v0 }
0x1850   :  { %2409 = vmatpush3.msra.mxu0 %v2871_v39 }
0x1851   :  { %2410 = vmatprep.subr.mxu0 %v2580_v0 }
0x1852   :  { %2411 = vmatpush3.msra.mxu0 %v2878_v40 }
0x1853   :  { %2426 = vmatprep.subr.mxu0 %v2580_v0 }
0x190b   :  { %v1468_v52 = vpop.f32.mrf.mxu0 }
0x190c   :  { %v1472_v53 = vadd.f32 %v1468_v52, %v1155_v50 }
0x190d   :  { %v2392_v54 = vpop.f32.mrf.mxu0 }
0x190e   :  { %2532 = vtanh.f32 %v1472_v53  ;;  %v2125_v56 = vmul.f32 -1.442695, %v1472_v53 }
0x1910   :  { %2534 = vpow2.f32 %v2125_v56 }
0x191b   :  { %v2533_v2 = vpop.eup %2532 }
0x191c   :  { %1482 = vrot.lane.b32.xlu0 %v2533_v2, %s2582_s23 }
0x191d   :  { %v2535_v9 = vpop.eup %2534 }
0x191e   :  { %v1476_v57 = vadd.f32 1.0, %v2535_v9 }
0x1920   :  { %2536 = vrcp.f32 %v1476_v57 }
0x192d   :  { %v2537_v59 = vpop.eup %2536 }
0x192e   :  { %v1480_v5 = vmul.f32 %v2537_v59, %v1387_v58 }
0x198e   :  { %v1483_v60 = vpop.permute.xlu0 %1482 }
0x198f   :  { %v1485_v61 = vmul.f32 %v2537_v59, %v1483_v60 }
0x1991   :  { %1487 = vrot.lane.b32.xlu1 %v1485_v61, %s2583_s3 }
0x1a03   :  { %v1488_v62 = vpop.permute.xlu1 %1487 }
0x1a04   :  { %v1490_v6 = vadd.f32 %v1488_v62, %v1480_v5  ;;  %v1175_v5 = vadd.f32 %v2915_v51, %v2967_v49 }
0x1a06   :  { %2538 = vtanh.f32 %v1490_v6 }
0x1a13   :  { %v2539_v63 = vpop.eup %2538 }
0x1a14   :  { %1493 = vrot.lane.b32.xlu0 %v2539_v63, %s2582_s23 }
0x1a86   :  { %v1494_v1 = vpop.permute.xlu0 %1493 }
0x1a87   :  { %v1496_v7 = vmul.f32 %v2537_v59, %v1494_v1 }
0x1a89   :  { %1498 = vrot.lane.b32.xlu1 %v1496_v7, %s2583_s3 }
0x1afb   :  { %v1499_v3 = vpop.permute.xlu1 %1498 }
0x1afc   :  { %1501 = vst.msk [vmem:[#allocation3 + $0x10] sm:$0xff] %vm196_vm3, %v1499_v3  ;;  %2402 = vmatmul.mubr.msk.f32.vlgmr.msra.gmra.mxu1 %vm196_vm3, %v1499_v3 }
0x1afd   :  { %2416 = vmatpush3.msra.mxu1 %v2858_v37  ;;  %2423 = vmatprep.mubr.msk.f32.mxu1 %vm2581_vm2, %v2580_v0 }
0x1afe   :  { %2417 = vmatprep.subr.mxu1 %v2580_v0 }
0x1aff   :  { %2418 = vmatpush3.msra.mxu1 %v2864_v38 }
0x1b00   :  { %2419 = vmatprep.subr.mxu1 %v2580_v0 }
0x1b01   :  { %2420 = vmatpush3.msra.mxu1 %v2871_v39 }
0x1b02   :  { %2421 = vmatprep.subr.mxu1 %v2580_v0 }
0x1b03   :  { %2422 = vmatpush3.msra.mxu1 %v2878_v40 }
0x1b04   :  { %2437 = vmatprep.subr.mxu1 %v2580_v0 }
0x1bbc   :  { %v1571_v55 = vpop.f32.mrf.mxu1 }
0x1bbd   :  { %v1575_v8 = vadd.f32 %v1571_v55, %v1160_v4 }
0x1bbe   :  { %v2403_v10 = vpop.f32.mrf.mxu1 }
0x1bbf   :  { %2540 = vtanh.f32 %v1575_v8  ;;  %v2127_v12 = vmul.f32 -1.442695, %v1575_v8 }
0x1bc1   :  { %2542 = vpow2.f32 %v2127_v12 }
0x1bcc   :  { %v2541_v11 = vpop.eup %2540 }
0x1bcd   :  { %1585 = vrot.lane.b32.xlu0 %v2541_v11, %s2582_s23 }
0x1bce   :  { %v2543_v13 = vpop.eup %2542 }
0x1bcf   :  { %v1579_v14 = vadd.f32 1.0, %v2543_v13 }
0x1bd1   :  { %2544 = vrcp.f32 %v1579_v14 }
0x1bde   :  { %v2545_v15 = vpop.eup %2544 }
0x1bdf   :  { %v1583_v18 = vmul.f32 %v2545_v15, %v1490_v6 }
0x1c3f   :  { %v1586_v16 = vpop.permute.xlu0 %1585 }
0x1c40   :  { %v1588_v17 = vmul.f32 %v2545_v15, %v1586_v16 }
0x1c42   :  { %1590 = vrot.lane.b32.xlu1 %v1588_v17, %s2583_s3  ;;  %v1180_v17 = vadd.f32 %v2965_v48, %v2915_v51 }
0x1cb4   :  { %v1591_v19 = vpop.permute.xlu1 %1590 }
0x1cb5   :  { %v1593_v20 = vadd.f32 %v1591_v19, %v1583_v18 }
0x1cb7   :  { %2546 = vtanh.f32 %v1593_v20 }
0x1cc4   :  { %v2547_v21 = vpop.eup %2546 }
0x1cc5   :  { %1596 = vrot.lane.b32.xlu0 %v2547_v21, %s2582_s23 }
0x1d37   :  { %v1597_v22 = vpop.permute.xlu0 %1596 }
0x1d38   :  { %v1599_v23 = vmul.f32 %v2545_v15, %v1597_v22 }
0x1d3a   :  { %1601 = vrot.lane.b32.xlu1 %v1599_v23, %s2583_s3 }
0x1dac   :  { %v1602_v24 = vpop.permute.xlu1 %1601 }
0x1dad   :  { %1604 = vst.msk [vmem:[#allocation3 + $0x18] sm:$0xff] %vm196_vm3, %v1602_v24  ;;  %2413 = vmatmul.mubr.msk.f32.vlgmr.msra.gmra.mxu0 %vm196_vm3, %v1602_v24 }
0x1dae   :  { %2427 = vmatpush3.msra.mxu0 %v2858_v37  ;;  %2434 = vmatprep.mubr.msk.f32.mxu0 %vm2581_vm2, %v2580_v0 }
0x1daf   :  { %2428 = vmatprep.subr.mxu0 %v2580_v0 }
0x1db0   :  { %2429 = vmatpush3.msra.mxu0 %v2864_v38 }
0x1db1   :  { %2430 = vmatprep.subr.mxu0 %v2580_v0 }
0x1db2   :  { %2431 = vmatpush3.msra.mxu0 %v2871_v39 }
0x1db3   :  { %2432 = vmatprep.subr.mxu0 %v2580_v0 }
0x1db4   :  { %2433 = vmatpush3.msra.mxu0 %v2878_v40 }
0x1e6d   :  { %v1674_v26 = vpop.f32.mrf.mxu0 }
0x1e6e   :  { %v1678_v27 = vadd.f32 %v1674_v26, %v1165_v25 }
0x1e6f   :  { %v2414_v28 = vpop.f32.mrf.mxu0 }
0x1e70   :  { %2548 = vtanh.f32 %v1678_v27  ;;  %v2129_v30 = vmul.f32 -1.442695, %v1678_v27 }
0x1e72   :  { %2550 = vpow2.f32 %v2129_v30  ;;  %v2017_v30 = vld [vmem:[#allocation3] sm:$0xff] }
0x1e7d   :  { %v2549_v29 = vpop.eup %2548 }
0x1e7e   :  { %1688 = vrot.lane.b32.xlu0 %v2549_v29, %s2582_s23 }
0x1e7f   :  { %v2551_v31 = vpop.eup %2550 }
0x1e80   :  { %v1682_v32 = vadd.f32 1.0, %v2551_v31  ;;  %v2136_v31 = vld [vmem:[%s3095_s7] ss:$0 sm:$0xff] }
0x1e82   :  { %2552 = vrcp.f32 %v1682_v32  ;;  %v2032_v32 = vmul.f32 %v2136_v31, %v2017_v30 }
0x1e8f   :  { %v2553_v33 = vpop.eup %2552 }
0x1e90   :  { %v1686_v58 = vmul.f32 %v2553_v33, %v1593_v20 }
0x1ef0   :  { %v1689_v34 = vpop.permute.xlu0 %1688 }
0x1ef1   :  { %v1691_v35 = vmul.f32 %v2553_v33, %v1689_v34  ;;  %v2040_v34 = vsel %vm196_vm3, %v2032_v32, 0.0 }
0x1ef3   :  { %1693 = vrot.lane.b32.xlu1 %v1691_v35, %s2583_s3 }
0x1f65   :  { %v1694_v36 = vpop.permute.xlu1 %1693 }
0x1f66   :  { %v1696_v41 = vadd.f32 %v1694_v36, %v1686_v58  ;;  %v2020_v58 = vld [vmem:[#allocation3 + $0x18] sm:$0xff] }
0x1f68   :  { %2554 = vtanh.f32 %v1696_v41 }
0x1f75   :  { %v2555_v42 = vpop.eup %2554 }
0x1f76   :  { %1699 = vrot.lane.b32.xlu0 %v2555_v42, %s2582_s23 }
0x1fe8   :  { %v1700_v43 = vpop.permute.xlu0 %1699 }
0x1fe9   :  { %v1702_v44 = vmul.f32 %v2553_v33, %v1700_v43  ;;  %v2019_v33 = vld [vmem:[#allocation3 + $0x10] sm:$0xff] }
0x1fea   :  { %v2034_v35 = vmul.f32 %v2136_v31, %v2019_v33 }
0x1feb   :  { %1704 = vrot.lane.b32.xlu1 %v1702_v44, %s2583_s3 }
0x1fec   :  { %v2046_v36 = vsel %vm196_vm3, %v2034_v35, 0.0 }
0x205d   :  { %v1705_v45 = vpop.permute.xlu1 %1704 }
0x205e   :  { %1707 = vst.msk [vmem:[#allocation3 + $0x20] sm:$0xff] %vm196_vm3, %v1705_v45  ;;  %2424 = vmatmul.mubr.msk.f32.vlgmr.msra.gmra.mxu1 %vm196_vm3, %v1705_v45 }
0x205f   :  { %2438 = vmatpush3.msra.mxu1 %v2858_v37  ;;  %2445 = vmatprep.mubr.msk.f32.mxu1 %vm2581_vm2, %v2580_v0 }
0x2060   :  { %2439 = vmatprep.subr.mxu1 %v2580_v0 }
0x2061   :  { %2440 = vmatpush3.msra.mxu1 %v2864_v38 }
0x2062   :  { %2441 = vmatprep.subr.mxu1 %v2580_v0 }
0x2063   :  { %2442 = vmatpush3.msra.mxu1 %v2871_v39 }
0x2064   :  { %2443 = vmatprep.subr.mxu1 %v2580_v0 }
0x2065   :  { %2444 = vmatpush3.msra.mxu1 %v2878_v40 }
0x211e   :  { %v1777_v50 = vpop.f32.mrf.mxu1 }
0x211f   :  { %v1781_v37 = vadd.f32 %v1777_v50, %v1170_v47 }
0x2120   :  { %v2425_v52 = vpop.f32.mrf.mxu1 }
0x2121   :  { %2556 = vtanh.f32 %v1781_v37  ;;  %v2131_v54 = vmul.f32 -1.442695, %v1781_v37  ;;  %v2018_v37 = vld [vmem:[#allocation3 + $0x8] sm:$0xff] }
0x2122   :  { %v2033_v52 = vmul.f32 %v2136_v31, %v2018_v37 }
0x2123   :  { %2558 = vpow2.f32 %v2131_v54 }
0x2124   :  { %v2043_v54 = vsel %vm196_vm3, %v2033_v52, 0.0 }
0x212e   :  { %v2557_v53 = vpop.eup %2556 }
0x212f   :  { %1791 = vrot.lane.b32.xlu0 %v2557_v53, %s2582_s23  ;;  %v2021_v53 = vld [vmem:[#allocation3 + $0x20] sm:$0xff] }
0x2130   :  { %v2559_v38 = vpop.eup %2558 }
0x2131   :  { %v1785_v2 = vadd.f32 1.0, %v2559_v38  ;;  %v2036_v38 = vmul.f32 %v2136_v31, %v2021_v53 }
0x2133   :  { %2560 = vrcp.f32 %v1785_v2 }
0x2140   :  { %v2561_v39 = vpop.eup %2560 }
0x2141   :  { %v1789_v40 = vmul.f32 %v2561_v39, %v1696_v41  ;;  %v2035_v41 = vmul.f32 %v2136_v31, %v2020_v58 }
0x2143   :  { %v2049_v43 = vsel %vm196_vm3, %v2035_v41, 0.0 }
0x21a1   :  { %v1792_v56 = vpop.permute.xlu0 %1791 }
0x21a2   :  { %v1794_v0 = vmul.f32 %v2561_v39, %v1792_v56 }
0x21a4   :  { %1796 = vrot.lane.b32.xlu1 %v1794_v0, %s2583_s3 }
0x2216   :  { %v1797_v9 = vpop.permute.xlu1 %1796 }
0x2217   :  { %v1799_v46 = vadd.f32 %v1797_v9, %v1789_v40  ;;  %v2065_v40 = vstv %s3096_s8 }
0x2219   :  { %2562 = vtanh.f32 %v1799_v46 }
0x2226   :  { %v2563_v57 = vpop.eup %2562 }
0x2227   :  { %1802 = vrot.lane.b32.xlu0 %v2563_v57, %s2582_s23 }
0x2299   :  { %v1803_v59 = vpop.permute.xlu0 %1802 }
0x229a   :  { %v1805_v60 = vmul.f32 %v2561_v39, %v1803_v59  ;;  %v2052_v39 = vsel %vm196_vm3, %v2036_v38, 0.0 }
0x229c   :  { %1807 = vrot.lane.b32.xlu1 %v1805_v60, %s2583_s3 }
0x230e   :  { %v1808_v61 = vpop.permute.xlu1 %1807 }
0x230f   :  { %1810 = vst.msk [vmem:[#allocation3 + $0x28] sm:$0xff] %vm196_vm3, %v1808_v61  ;;  %2435 = vmatmul.mubr.msk.f32.vlgmr.msra.gmra.mxu0 %vm196_vm3, %v1808_v61 }
0x2316   :  { %v2022_v42 = vld [vmem:[#allocation3 + $0x28] sm:$0xff] }
0x2317   :  { %v2037_v44 = vmul.f32 %v2136_v31, %v2022_v42 }
0x2319   :  { %v2055_v45 = vsel %vm196_vm3, %v2037_v44, 0.0 }
0x23cf   :  { %v1880_v62 = vpop.f32.mrf.mxu0 }
0x23d0   :  { %v1884_v6 = vadd.f32 %v1880_v62, %v1175_v5 }
0x23d1   :  { %v2436_v63 = vpop.f32.mrf.mxu0 }
0x23d2   :  { %2564 = vtanh.f32 %v1884_v6  ;;  %v2133_v7 = vmul.f32 -1.442695, %v1884_v6 }
0x23d4   :  { %2566 = vpow2.f32 %v2133_v7 }
0x23df   :  { %v2565_v1 = vpop.eup %2564 }
0x23e0   :  { %1894 = vrot.lane.b32.xlu0 %v2565_v1, %s2582_s23 }
0x23e1   :  { %v2567_v3 = vpop.eup %2566 }
0x23e2   :  { %v1888_v4 = vadd.f32 1.0, %v2567_v3 }
0x23e4   :  { %2568 = vrcp.f32 %v1888_v4 }
0x23f1   :  { %v2569_v55 = vpop.eup %2568 }
0x23f2   :  { %v1892_v11 = vmul.f32 %v2569_v55, %v1799_v46 }
0x2452   :  { %v1895_v8 = vpop.permute.xlu0 %1894 }
0x2453   :  { %v1897_v10 = vmul.f32 %v2569_v55, %v1895_v8 }
0x2455   :  { %1899 = vrot.lane.b32.xlu1 %v1897_v10, %s2583_s3 }
0x24c7   :  { %v1900_v12 = vpop.permute.xlu1 %1899 }
0x24c8   :  { %v1902_v49 = vadd.f32 %v1900_v12, %v1892_v11 }
0x24ca   :  { %2570 = vtanh.f32 %v1902_v49 }
0x24d7   :  { %v2571_v13 = vpop.eup %2570 }
0x24d8   :  { %1905 = vrot.lane.b32.xlu0 %v2571_v13, %s2582_s23 }
0x254a   :  { %v1906_v14 = vpop.permute.xlu0 %1905 }
0x254b   :  { %v1908_v15 = vmul.f32 %v2569_v55, %v1906_v14 }
0x254d   :  { %1910 = vrot.lane.b32.xlu1 %v1908_v15, %s2583_s3 }
0x25bf   :  { %v1911_v16 = vpop.permute.xlu1 %1910 }
0x25c0   :  { %1913 = vst.msk [vmem:[#allocation3 + $0x30] sm:$0xff] %vm196_vm3, %v1911_v16  ;;  %2446 = vmatmul.mubr.msk.f32.vlgmr.msra.gmra.mxu1 %vm196_vm3, %v1911_v16 }
0x25c7   :  { %v2023_v2 = vld [vmem:[#allocation3 + $0x30] sm:$0xff] }
0x25c8   :  { %v2038_v56 = vmul.f32 %v2136_v31, %v2023_v2 }
0x25ca   :  { %v2058_v0 = vsel %vm196_vm3, %v2038_v56, 0.0 }
0x2680   :  { %v1983_v18 = vpop.f32.mrf.mxu1 }
0x2681   :  { %v1987_v19 = vadd.f32 %v1983_v18, %v1180_v17 }
0x2682   :  { %v2447_v20 = vpop.f32.mrf.mxu1 }
0x2683   :  { %2572 = vtanh.f32 %v1987_v19  ;;  %v2135_v22 = vmul.f32 -1.442695, %v1987_v19 }
0x2685   :  { %2574 = vpow2.f32 %v2135_v22 }
0x2690   :  { %v2573_v21 = vpop.eup %2572 }
0x2691   :  { %1997 = vrot.lane.b32.xlu0 %v2573_v21, %s2582_s23 }
0x2692   :  { %v2575_v23 = vpop.eup %2574 }
0x2693   :  { %v1991_v24 = vadd.f32 1.0, %v2575_v23 }
0x2695   :  { %2576 = vrcp.f32 %v1991_v24 }
0x26a2   :  { %v2577_v25 = vpop.eup %2576 }
0x26a3   :  { %v1995_v28 = vmul.f32 %v2577_v25, %v1902_v49 }
0x2703   :  { %v1998_v26 = vpop.permute.xlu0 %1997 }
0x2704   :  { %v2000_v27 = vmul.f32 %v2577_v25, %v1998_v26 }
0x2706   :  { %2002 = vrot.lane.b32.xlu1 %v2000_v27, %s2583_s3 }
0x2778   :  { %v2003_v29 = vpop.permute.xlu1 %2002 }
0x2779   :  { %v2005_v51 = vadd.f32 %v2003_v29, %v1995_v28 }
0x277b   :  { %2578 = vtanh.f32 %v2005_v51 }
0x2788   :  { %v2579_v48 = vpop.eup %2578 }
0x2789   :  { %2008 = vrot.lane.b32.xlu0 %v2579_v48, %s2582_s23 }
0x27a8   :  { %2041 = vadd.xlane.f32.xlu0 %v2040_v34 }
0x27ac   :  { %2047 = vadd.xlane.f32.xlu0 %v2046_v36 }
0x27b0   :  { %2050 = vadd.xlane.f32.xlu0 %v2049_v43 }
0x27b4   :  { %2056 = vadd.xlane.f32.xlu0 %v2055_v45 }
0x27fb   :  { %v2009_v47 = vpop.permute.xlu0 %2008 }
0x27fc   :  { %v2011_v50 = vmul.f32 %v2577_v25, %v2009_v47 }
0x27fe   :  { %2013 = vrot.lane.b32.xlu1 %v2011_v50, %s2583_s3 }
0x2822   :  { %2044 = vadd.xlane.f32.xlu1 %v2043_v54 }
0x2826   :  { %2053 = vadd.xlane.f32.xlu1 %v2052_v39 }
0x282a   :  { %2059 = vadd.xlane.f32.xlu1 %v2058_v0 }
0x2831   :  { %v2042_v9 = vpop.xlane.xlu0 %2041 }
0x2832   :  { %v2066_v46 = vadd.f32 %v2065_v40, %v2042_v9 }
0x2834   :  { %2075 = vst.msk [vmem:[%s3097_s9] sm:$0xff] %vm2074_vm4, %v2066_v46 }
0x2835   :  { %v2048_v57 = vpop.xlane.xlu0 %2047 }
0x2836   :  { %v2068_v59 = vadd.f32 %v2065_v40, %v2048_v57 }
0x2838   :  { %2077 = vst.msk [vmem:[%s3097_s9 + $0x10] sm:$0xff] %vm2074_vm4, %v2068_v59 }
0x2839   :  { %v2051_v60 = vpop.xlane.xlu0 %2050 }
0x283a   :  { %v2069_v61 = vadd.f32 %v2065_v40, %v2051_v60 }
0x283c   :  { %2078 = vst.msk [vmem:[%s3097_s9 + $0x18] sm:$0xff] %vm2074_vm4, %v2069_v61 }
0x283d   :  { %v2057_v5 = vpop.xlane.xlu0 %2056 }
0x283e   :  { %v2071_v62 = vadd.f32 %v2065_v40, %v2057_v5 }
0x2840   :  { %2080 = vst.msk [vmem:[%s3097_s9 + $0x28] sm:$0xff] %vm2074_vm4, %v2071_v62 }
0x2870   :  { %v2014_v6 = vpop.permute.xlu1 %2013 }
0x2871   :  { %2016 = vst.msk [vmem:[#allocation3 + $0x38] sm:$0xff] %vm196_vm3, %v2014_v6 }
0x2878   :  { %v2024_v63 = vld [vmem:[#allocation3 + $0x38] sm:$0xff] }
0x2879   :  { %v2039_v1 = vmul.f32 %v2136_v31, %v2024_v63 }
0x287b   :  { %v2061_v7 = vsel %vm196_vm3, %v2039_v1, 0.0 }
0x287c   :  { %2062 = vadd.xlane.f32.xlu0 %v2061_v7 }
0x28ab   :  { %v2045_v3 = vpop.xlane.xlu1 %2044 }
0x28ac   :  { %v2067_v4 = vadd.f32 %v2065_v40, %v2045_v3 }
0x28ae   :  { %2076 = vst.msk [vmem:[%s3097_s9 + $0x8] sm:$0xff] %vm2074_vm4, %v2067_v4 }
0x28af   :  { %v2054_v55 = vpop.xlane.xlu1 %2053 }
0x28b0   :  { %v2070_v8 = vadd.f32 %v2065_v40, %v2054_v55 }
0x28b2   :  { %2079 = vst.msk [vmem:[%s3097_s9 + $0x20] sm:$0xff] %vm2074_vm4, %v2070_v8 }
0x28b3   :  { %v2060_v10 = vpop.xlane.xlu1 %2059 }
0x28b4   :  { %v2072_v11 = vadd.f32 %v2065_v40, %v2060_v10 }
0x28b6   :  { %2081 = vst.msk [vmem:[%s3097_s9 + $0x30] sm:$0xff] %vm2074_vm4, %v2072_v11 }
0x2905   :  { %v2063_v12 = vpop.xlane.xlu0 %2062 }
0x2906   :  { %v2073_v49 = vadd.f32 %v2065_v40, %v2063_v12 }
0x2908   :  { %2082 = vst.msk [vmem:[%s3097_s9 + $0x38] sm:$0xff] %vm2074_vm4, %v2073_v49 }

</bundles_post_ra>
